<compile_context>
chip_gen: v5e
topology: v5e:2x2
jax: 0.10.0
libtpu: 0.0.40
codegen_flags: <defaults>
</compile_context>

<pallas_src>
import functools
import math

import jax
import jax.numpy as jnp
import numpy as np
from jax.experimental import pallas as pl
from jax.experimental.pallas import tpu as pltpu

LANE = 128   # TPU vreg lane width; channels are zero-padded to this


def _round_up(x, m):
    return ((x + m - 1) // m) * m


# ----------------------------------------------------------------------------
# Fused Pallas kernel: a run of consecutive TemporalBlocks on one time tile of
# one batch element.  Per block:
#   conv1 -> chomp -> relu -> conv2 -> chomp -> relu -> (+residual) -> relu
# Causal history is carried across time tiles in VMEM slab scratches.
# ----------------------------------------------------------------------------
def _fused_blocks_kernel(*refs, tile_l, kernel_size, metas):
    K = kernel_size
    T = tile_l
    nb = len(metas)

    # ---- parse refs: x, per-block weights, output, per-block slab scratches -
    x_ref = refs[0]
    pos = 1
    wrefs = []
    for m in metas:
        n = 6 if m["has_downsample"] else 4
        wrefs.append(refs[pos:pos + n])
        pos += n
    o_ref = refs[pos]
    pos += 1
    slabs = refs[pos:]
    assert len(slabs) == 2 * nb

    cdtype = x_ref.dtype

    # ---- zero the causal-history rows of every slab on the first time tile --
    # (this IS PyTorch's zero padding + Chomp1d for both convs of every block)
    @pl.when(pl.program_id(1) == 0)
    def _():
        for j, m in enumerate(metas):
            hp = m["halo_pad"]
            sx0, sh0 = slabs[2 * j], slabs[2 * j + 1]
            sx0[0:hp, :] = jnp.zeros((hp, sx0.shape[1]), sx0.dtype)
            sh0[0:hp, :] = jnp.zeros((hp, sh0.shape[1]), sh0.dtype)

    cur = x_ref[...]                          # (T, Cin_p) matmul dtype
    for j, m in enumerate(metas):
        d = m["dilation"]
        h = (K - 1) * d                       # causal lookback of this block
        hp = m["halo_pad"]                    # lookback rounded up to 8 rows
        off = hp - h
        if m["has_downsample"]:
            w1, b1, w2, b2, wd, bd = wrefs[j]
        else:
            w1, b1, w2, b2 = wrefs[j]
        sx, sh = slabs[2 * j], slabs[2 * j + 1]

        # ---- conv1 (dilated, causal) -> relu --------------------------------
        sx[hp:hp + T, :] = cur                # 8-aligned store of the new rows
        acc = jnp.dot(sx[off:off + T, :], w1[0],
                      preferred_element_type=jnp.float32)
        for k in range(1, K):
            acc = acc + jnp.dot(sx[off + k * d: off + k * d + T, :], w1[k],
                                preferred_element_type=jnp.float32)
        acc = acc + b1[...].astype(jnp.float32)
        h1 = jnp.maximum(acc, 0.0).astype(cdtype)

        # ---- conv2 (dilated, causal) -> relu --------------------------------
        sh[hp:hp + T, :] = h1
        acc2 = jnp.dot(sh[off:off + T, :], w2[0],
                       preferred_element_type=jnp.float32)
        for k in range(1, K):
            acc2 = acc2 + jnp.dot(sh[off + k * d: off + k * d + T, :], w2[k],
                                  preferred_element_type=jnp.float32)
        acc2 = acc2 + b2[...].astype(jnp.float32)
        h2 = jnp.maximum(acc2, 0.0)

        # ---- residual (+ optional 1x1 downsample) + final relu --------------
        if m["has_downsample"]:
            res = jnp.dot(cur, wd[...], preferred_element_type=jnp.float32)
            res = res + bd[...].astype(jnp.float32)
        else:
            res = cur.astype(jnp.float32)
        out = jnp.maximum(h2 + res, 0.0)

        # ---- roll carries: keep the most recent hp rows for the next tile ---
        sx[0:hp, :] = sx[T:T + hp, :]
        sh[0:hp, :] = sh[T:T + hp, :]

        if j + 1 < nb:
            cur = out.astype(cdtype)          # next block's input stays in VMEM
        else:
            o_ref[...] = out.astype(o_ref.dtype)


# ----------------------------------------------------------------------------
# Wrapper for one fused group of blocks
# ----------------------------------------------------------------------------
def _fused_group_forward(h, prepared, group, tile_l, *, kernel_size, vmem_limit):
    B, l_pad, _ = h.shape
    assert l_pad % tile_l == 0
    n_tiles = l_pad // tile_l
    K = kernel_size
    layers = [prepared[g] for g in group]
    cin_p = layers[0]["cin_p"]
    cout_p = layers[-1]["cout_p"]
    dtype = h.dtype
    itemsize = jnp.dtype(dtype).itemsize

    args = [h]
    in_specs = [pl.BlockSpec((None, tile_l, cin_p), lambda b, i: (b, i, 0))]
    metas = []
    scratch_shapes = []
    flops = 0
    weight_bytes = 0
    for lyr in layers:
        # weights/biases: constant index maps -> DMA'd once, VMEM-resident
        args += [lyr["w1"], lyr["b1"], lyr["w2"], lyr["b2"]]
        in_specs += [
            pl.BlockSpec(lyr["w1"].shape, lambda b, i: (0, 0, 0)),
            pl.BlockSpec(lyr["b1"].shape, lambda b, i: (0, 0)),
            pl.BlockSpec(lyr["w2"].shape, lambda b, i: (0, 0, 0)),
            pl.BlockSpec(lyr["b2"].shape, lambda b, i: (0, 0)),
        ]
        wlist = [lyr["w1"], lyr["b1"], lyr["w2"], lyr["b2"]]
        if lyr["has_downsample"]:
            args += [lyr["wd"], lyr["bd"]]
            in_specs += [
                pl.BlockSpec(lyr["wd"].shape, lambda b, i: (0, 0)),
                pl.BlockSpec(lyr["bd"].shape, lambda b, i: (0, 0)),
            ]
            wlist += [lyr["wd"], lyr["bd"]]
        metas.append(dict(dilation=lyr["dilation"],
                          has_downsample=lyr["has_downsample"],
                          halo_pad=lyr["halo_pad"]))
        scratch_shapes += [
            pltpu.VMEM((lyr["halo_pad"] + tile_l, lyr["cin_p"]), dtype),
            pltpu.VMEM((lyr["halo_pad"] + tile_l, lyr["cmid_p"]), dtype),
        ]
        flops += 2 * B * l_pad * K * (lyr["cin"] * lyr["cout"] + lyr["cout"] * lyr["cout"])
        if lyr["has_downsample"]:
            flops += 2 * B * l_pad * lyr["cin"] * lyr["cout"]
        weight_bytes += sum(int(np.prod(a.shape)) * jnp.dtype(a.dtype).itemsize
                            for a in wlist)

    kernel = functools.partial(_fused_blocks_kernel, tile_l=tile_l,
                               kernel_size=K, metas=tuple(metas))

    bytes_accessed = itemsize * B * l_pad * (cin_p + cout_p) + weight_bytes

    return pl.pallas_call(
        kernel,
        out_shape=jax.ShapeDtypeStruct((B, l_pad, cout_p), dtype),
        grid=(B, n_tiles),
        in_specs=in_specs,
        out_specs=pl.BlockSpec((None, tile_l, cout_p), lambda b, i: (b, i, 0)),
        scratch_shapes=scratch_shapes,
        compiler_params=pltpu.CompilerParams(
            # batch tiles are independent -> megacore; time tiles carry state
            dimension_semantics=("parallel", "arbitrary"),
            vmem_limit_bytes=int(vmem_limit)),
        cost_estimate=pl.CostEstimate(flops=int(flops), transcendentals=0,
                                      bytes_accessed=int(bytes_accessed)),
    )(*args)


# ----------------------------------------------------------------------------
# Planning: generation-aware VMEM budget, per-group tile size, greedy fusion
# ----------------------------------------------------------------------------
def _vmem_config():
    try:
        cap = int(pltpu.get_tpu_info().vmem_capacity_bytes)
    except Exception:
        cap = 64 * 1024 * 1024            # conservative default (v7x-sized)
    max_tile = 2048 if cap >= 96 * 1024 * 1024 else 1024
    budget = int(0.55 * cap)              # working-set target for the estimator
    vmem_limit = int(0.75 * cap)          # hard limit handed to Mosaic
    return max_tile, budget, vmem_limit


def _est_group_vmem(layers, K, t, dtype):
    """Conservative VMEM estimate for fusing `layers` at time tile t."""
    itemsize = jnp.dtype(dtype).itemsize
    total = 2 * t * layers[0]["cin_p"] * itemsize      # input tile, double-buffered
    total += 2 * t * layers[-1]["cout_p"] * itemsize   # output tile, double-buffered
    for lyr in layers:
        wbytes = (int(lyr["w1"].size) + int(lyr["w2"].size)) * itemsize
        wbytes += (int(lyr["b1"].size) + int(lyr["b2"].size)) * 4
        if lyr["has_downsample"]:
            wbytes += int(lyr["wd"].size) * itemsize + int(lyr["bd"].size) * 4
        total += 2 * wbytes                            # assume 2 buffers (safe)
        total += (lyr["halo_pad"] + t) * (lyr["cin_p"] + lyr["cmid_p"]) * itemsize
        total += 4 * t * max(lyr["cmid_p"], lyr["cout_p"]) * 4   # f32 temporaries
    return total


def _tile_candidates(seq_len, max_tile):
    top = min(_round_up(max(seq_len, 8), 8), max_tile)
    cands = [top]
    t = top // 2
    while t >= 8:
        t8 = _round_up(t, 8)
        if t8 < cands[-1]:
            cands.append(t8)
        t //= 2
    if cands[-1] > 8:
        cands.append(8)
    return cands


def _best_tile(layers, K, seq_len, max_tile, budget, dtype):
    for t in _tile_candidates(seq_len, max_tile):
        if _est_group_vmem(layers, K, t, dtype) <= budget:
            return t
    return None


def plan_tcn(prepared, *, kernel_size, seq_len, max_tile=None):
    """Greedily fuse consecutive blocks and pick a time tile per fused group."""
    cap_tile, budget, vmem_limit = _vmem_config()
    if max_tile is not None:
        cap_tile = min(cap_tile, max_tile)
    L8 = _round_up(max(seq_len, 8), 8)
    dtype = prepared[0]["w1"].dtype
    n = len(prepared)
    groups = []
    i = 0
    while i < n:
        group = [i]
        t = _best_tile([prepared[i]], kernel_size, seq_len, cap_tile, budget, dtype)
        if t is None:
            t = 8                          # extreme configs: smallest tile
        j = i + 1
        while j < n:
            cand = [prepared[g] for g in group + [j]]
            t2 = _best_tile(cand, kernel_size, seq_len, cap_tile, budget, dtype)
            # fuse only if it does not force the tile below a useful size
            if t2 is None or t2 < min(t, 256, L8):
                break
            group.append(j)
            t = t2
            j += 1
        groups.append((tuple(group), t))
        i = j
    return groups, vmem_limit


# ----------------------------------------------------------------------------
# Parameter construction (deterministic, mirrors the PyTorch module shapes)
# ----------------------------------------------------------------------------
def _weight_norm_effective(v, g):
    # PyTorch weight_norm (dim=0): w[o] = g[o] * v[o] / ||v[o]||_2
    norm = jnp.sqrt(jnp.sum(v * v, axis=(1, 2), keepdims=True))
    return g[:, None, None] * v / norm


def init_tcn_params(key, num_inputs, num_channels, kernel_size):
    """PyTorch-layout params per block: conv weights (Cout, Cin, K), biases (Cout,)."""
    params = []
    for i, out_ch in enumerate(num_channels):
        in_ch = num_inputs if i == 0 else num_channels[i - 1]
        key, k1, k2, k3, k4, k5, k6 = jax.random.split(key, 7)

        v1 = 0.01 * jax.random.normal(k1, (out_ch, in_ch, kernel_size), jnp.float32)
        g1 = jnp.sqrt(jnp.sum(v1 * v1, axis=(1, 2)))
        w1 = _weight_norm_effective(v1, g1)
        b1 = (1.0 / math.sqrt(in_ch * kernel_size)) * jax.random.normal(k2, (out_ch,), jnp.float32)

        v2 = 0.01 * jax.random.normal(k3, (out_ch, out_ch, kernel_size), jnp.float32)
        g2 = jnp.sqrt(jnp.sum(v2 * v2, axis=(1, 2)))
        w2 = _weight_norm_effective(v2, g2)
        b2 = (1.0 / math.sqrt(out_ch * kernel_size)) * jax.random.normal(k4, (out_ch,), jnp.float32)

        has_downsample = in_ch != out_ch
        if has_downsample:
            wd = 0.01 * jax.random.normal(k5, (out_ch, in_ch, 1), jnp.float32)
            bd = (1.0 / math.sqrt(in_ch)) * jax.random.normal(k6, (out_ch,), jnp.float32)
        else:
            wd = jnp.zeros((out_ch, in_ch, 1), jnp.float32)
            bd = jnp.zeros((out_ch,), jnp.float32)

        params.append(dict(w1=w1, b1=b1, w2=w2, b2=b2, wd=wd, bd=bd,
                           in_ch=in_ch, out_ch=out_ch, dilation=2 ** i,
                           has_downsample=has_downsample))
    return params


def _taps_kio(w_oik, cin_p, cout_p, dtype):
    # PyTorch layout (Cout, Cin, K) -> (K, Cin_p, Cout_p); slice [k] is tap k.
    cout, cin, K = w_oik.shape
    w = jnp.transpose(w_oik, (2, 1, 0))                              # (K, Cin, Cout)
    w = jnp.pad(w, ((0, 0), (0, cin_p - cin), (0, cout_p - cout)))   # zero lane pad
    return w.astype(dtype)


def prepare_tcn_params(params, kernel_size, dtype=jnp.bfloat16):
    """Hoist tap-reordering / 128-padding out of the forward (done once).

    Default matmul dtype is bf16 (f32 accumulation in-kernel); pass
    dtype=jnp.float32 for exact f32 convolutions.
    """
    assert kernel_size >= 1
    prepared = []
    for p in params:
        cin, cout = p["in_ch"], p["out_ch"]
        cin_p = _round_up(cin, LANE)
        cout_p = _round_up(cout, LANE)
        d = p["dilation"]
        halo = (kernel_size - 1) * d
        layer = dict(
            w1=_taps_kio(p["w1"], cin_p, cout_p, dtype),
            b1=jnp.pad(p["b1"], (0, cout_p - cout))[None, :].astype(jnp.float32),
            w2=_taps_kio(p["w2"], cout_p, cout_p, dtype),
            b2=jnp.pad(p["b2"], (0, cout_p - cout))[None, :].astype(jnp.float32),
            dilation=d, has_downsample=p["has_downsample"],
            halo=halo, halo_pad=_round_up(max(halo, 1), 8),
            cin=cin, cout=cout, cin_p=cin_p, cmid_p=cout_p, cout_p=cout_p,
        )
        if p["has_downsample"]:
            wd = jnp.transpose(p["wd"][:, :, 0], (1, 0))             # (Cin, Cout)
            wd = jnp.pad(wd, ((0, cin_p - cin), (0, cout_p - cout)))
            layer["wd"] = wd.astype(dtype)
            layer["bd"] = jnp.pad(p["bd"], (0, cout_p - cout))[None, :].astype(jnp.float32)
        prepared.append(layer)
    return prepared


# ----------------------------------------------------------------------------
# Full TemporalConvNet forward (Pallas)
# ----------------------------------------------------------------------------
def temporal_conv_net(x_ncl, prepared, *, kernel_size, max_tile=None):
    """x_ncl: (B, C, L) like PyTorch. Returns (B, num_channels[-1], L)."""
    B, c_in, L = x_ncl.shape
    dtype = prepared[0]["w1"].dtype
    cin_p = prepared[0]["cin_p"]

    h = jnp.transpose(x_ncl, (0, 2, 1)).astype(dtype)          # (B, L, C)
    h = jnp.pad(h, ((0, 0), (0, 0), (0, cin_p - c_in)))        # lane-pad channels

    groups, vmem_limit = plan_tcn(prepared, kernel_size=kernel_size,
                                  seq_len=L, max_tile=max_tile)
    for group, tile_l in groups:
        l_cur = h.shape[1]
        l_pad = _round_up(l_cur, tile_l)
        if l_pad != l_cur:
            # causal => trailing time padding never influences the first L rows
            h = jnp.pad(h, ((0, 0), (0, l_pad - l_cur), (0, 0)))
        h = _fused_group_forward(h, prepared, group, tile_l,
                                 kernel_size=kernel_size, vmem_limit=vmem_limit)

    return jnp.transpose(h[:, :L, :prepared[-1]["cout"]], (0, 2, 1))


# ----------------------------------------------------------------------------
# Pure-JAX reference (mirrors PyTorch semantics) for a correctness check
# ----------------------------------------------------------------------------
def _ref_conv1d(x_ncl, w_oik, b, dilation, padding):
    out = jax.lax.conv_general_dilated(
        x_ncl, w_oik, window_strides=(1,), padding=[(padding, padding)],
        rhs_dilation=(dilation,), dimension_numbers=("NCH", "OIH", "NCH"))
    return out + b[None, :, None]


def temporal_conv_net_ref(x_ncl, params, kernel_size):
    h = x_ncl
    for p in params:
        pad = (kernel_size - 1) * p["dilation"]
        o = _ref_conv1d(h, p["w1"], p["b1"], p["dilation"], pad)[:, :, :-pad]
        o = jnp.maximum(o, 0.0)
        o = _ref_conv1d(o, p["w2"], p["b2"], p["dilation"], pad)[:, :, :-pad]
        o = jnp.maximum(o, 0.0)
        res = h if not p["has_downsample"] else _ref_conv1d(h, p["wd"], p["bd"], 1, 0)
        h = jnp.maximum(o + res, 0.0)
    return h


# ----------------------------------------------------------------------------
if __name__ == "__main__":
    key = jax.random.PRNGKey(0)
    kx, kp, kx2 = jax.random.split(key, 3)

    # Small shapes consistent with the module: x is (batch, num_inputs, seq_len)
    B, num_inputs, L = 2, 4, 16
    kernel_size = 2
    x = jax.random.normal(kx, (B, num_inputs, L), jnp.float32)

    # --- Config A: 3 levels (dilations 1,2,4), f32 matmuls (exact vs reference)
    num_channels_a = [8, 8, 16]
    params_a = init_tcn_params(kp, num_inputs, num_channels_a, kernel_size)
    prep_a32 = prepare_tcn_params(params_a, kernel_size, dtype=jnp.float32)
    out_a32 = jax.block_until_ready(temporal_conv_net(x, prep_a32, kernel_size=kernel_size))
    ref_a = jax.block_until_ready(temporal_conv_net_ref(x, params_a, kernel_size))
    assert out_a32.shape == (B, num_channels_a[-1], L), out_a32.shape
    np.testing.assert_allclose(np.asarray(out_a32), np.asarray(ref_a), rtol=1e-4, atol=1e-4)

    # --- Config B: default bf16 MXU operands / f32 accumulation (fast path)
    prep_abf = prepare_tcn_params(params_a, kernel_size)   # default dtype=bf16
    out_abf = jax.block_until_ready(temporal_conv_net(x, prep_abf, kernel_size=kernel_size))
    np.testing.assert_allclose(np.asarray(out_abf.astype(jnp.float32)), np.asarray(ref_a),
                               rtol=1e-1, atol=1e-1)

    # --- Config C: deep dilations with (K-1)*dilation >= L (single time tile)
    num_channels_c = [8, 8, 16, 16, 16]          # dilations 1..16 with L = 16
    params_c = init_tcn_params(kp, num_inputs, num_channels_c, kernel_size)
    prep_c = prepare_tcn_params(params_c, kernel_size, dtype=jnp.float32)
    out_c = jax.block_until_ready(temporal_conv_net(x, prep_c, kernel_size=kernel_size))
    ref_c = jax.block_until_ready(temporal_conv_net_ref(x, params_c, kernel_size))
    np.testing.assert_allclose(np.asarray(out_c), np.asarray(ref_c), rtol=1e-4, atol=1e-4)

    # --- Config D: multiple time tiles (forced small tile) -> exercises the
    #     carried causal history across grid steps, incl. lookback > tile.
    Ld = 48
    xd = jax.random.normal(kx2, (B, num_inputs, Ld), jnp.float32)
    num_channels_d = [8, 8, 16, 16, 16, 16]      # dilations 1..32
    params_d = init_tcn_params(kp, num_inputs, num_channels_d, kernel_size)
    prep_d = prepare_tcn_params(params_d, kernel_size, dtype=jnp.float32)
    out_d = jax.block_until_ready(
        temporal_conv_net(xd, prep_d, kernel_size=kernel_size, max_tile=16))
    ref_d = jax.block_until_ready(temporal_conv_net_ref(xd, params_d, kernel_size))
    np.testing.assert_allclose(np.asarray(out_d), np.asarray(ref_d), rtol=1e-4, atol=1e-4)

    print("KERNEL_OK")
</pallas_src>

<mosaic_0001>
module attributes {stable_mosaic.version = 11 : i64} {
  func.func @_fused_blocks_kernel(%arg0: i32, %arg1: i32, %arg2: memref<1x16x128xf32, #tpu.memory_space<vmem>>, %arg3: memref<2x128x128xf32, #tpu.memory_space<vmem>>, %arg4: memref<1x128xf32, #tpu.memory_space<vmem>>, %arg5: memref<2x128x128xf32, #tpu.memory_space<vmem>>, %arg6: memref<1x128xf32, #tpu.memory_space<vmem>>, %arg7: memref<128x128xf32, #tpu.memory_space<vmem>>, %arg8: memref<1x128xf32, #tpu.memory_space<vmem>>, %arg9: memref<2x128x128xf32, #tpu.memory_space<vmem>>, %arg10: memref<1x128xf32, #tpu.memory_space<vmem>>, %arg11: memref<2x128x128xf32, #tpu.memory_space<vmem>>, %arg12: memref<1x128xf32, #tpu.memory_space<vmem>>, %arg13: memref<2x128x128xf32, #tpu.memory_space<vmem>>, %arg14: memref<1x128xf32, #tpu.memory_space<vmem>>, %arg15: memref<2x128x128xf32, #tpu.memory_space<vmem>>, %arg16: memref<1x128xf32, #tpu.memory_space<vmem>>, %arg17: memref<128x128xf32, #tpu.memory_space<vmem>>, %arg18: memref<1x128xf32, #tpu.memory_space<vmem>>, %arg19: memref<1x16x128xf32, #tpu.memory_space<vmem>>, %arg20: memref<24x128xf32, #tpu.memory_space<vmem>>, %arg21: memref<24x128xf32, #tpu.memory_space<vmem>>, %arg22: memref<24x128xf32, #tpu.memory_space<vmem>>, %arg23: memref<24x128xf32, #tpu.memory_space<vmem>>, %arg24: memref<24x128xf32, #tpu.memory_space<vmem>>, %arg25: memref<24x128xf32, #tpu.memory_space<vmem>>) attributes {dimension_semantics = [#tpu.dimension_semantics<parallel>, #tpu.dimension_semantics<arbitrary>], iteration_bounds = array<i64: 2, 1>, scalar_prefetch = 0 : i64, scratch_operands = 6 : i64, tpu.core_type = #tpu.core_type<tc>, window_params = [{transform_indices = @transform_0, window_bounds = array<i64: 1, 16, 128>}, {pipeline_mode = #tpu.pipeline_mode<synchronous>, transform_indices = @transform_1, window_bounds = array<i64: 2, 128, 128>}, {pipeline_mode = #tpu.pipeline_mode<synchronous>, transform_indices = @transform_2, window_bounds = array<i64: 1, 128>}, {pipeline_mode = #tpu.pipeline_mode<synchronous>, transform_indices = @transform_3, window_bounds = array<i64: 2, 128, 128>}, {pipeline_mode = #tpu.pipeline_mode<synchronous>, transform_indices = @transform_4, window_bounds = array<i64: 1, 128>}, {pipeline_mode = #tpu.pipeline_mode<synchronous>, transform_indices = @transform_5, window_bounds = array<i64: 128, 128>}, {pipeline_mode = #tpu.pipeline_mode<synchronous>, transform_indices = @transform_6, window_bounds = array<i64: 1, 128>}, {pipeline_mode = #tpu.pipeline_mode<synchronous>, transform_indices = @transform_7, window_bounds = array<i64: 2, 128, 128>}, {pipeline_mode = #tpu.pipeline_mode<synchronous>, transform_indices = @transform_8, window_bounds = array<i64: 1, 128>}, {pipeline_mode = #tpu.pipeline_mode<synchronous>, transform_indices = @transform_9, window_bounds = array<i64: 2, 128, 128>}, {pipeline_mode = #tpu.pipeline_mode<synchronous>, transform_indices = @transform_10, window_bounds = array<i64: 1, 128>}, {pipeline_mode = #tpu.pipeline_mode<synchronous>, transform_indices = @transform_11, window_bounds = array<i64: 2, 128, 128>}, {pipeline_mode = #tpu.pipeline_mode<synchronous>, transform_indices = @transform_12, window_bounds = array<i64: 1, 128>}, {pipeline_mode = #tpu.pipeline_mode<synchronous>, transform_indices = @transform_13, window_bounds = array<i64: 2, 128, 128>}, {pipeline_mode = #tpu.pipeline_mode<synchronous>, transform_indices = @transform_14, window_bounds = array<i64: 1, 128>}, {pipeline_mode = #tpu.pipeline_mode<synchronous>, transform_indices = @transform_15, window_bounds = array<i64: 128, 128>}, {pipeline_mode = #tpu.pipeline_mode<synchronous>, transform_indices = @transform_16, window_bounds = array<i64: 1, 128>}, {transform_indices = @transform_17, window_bounds = array<i64: 1, 16, 128>}]} {
    %c0_i32 = arith.constant 0 : i32
    %0 = arith.cmpi eq, %arg1, %c0_i32 : i32
    %1 = arith.extui %0 : i1 to i32
    %c0_i32_0 = arith.constant 0 : i32
    %2 = arith.cmpi ne, %1, %c0_i32_0 : i32
    scf.if %2 {
      %cst_138 = arith.constant 0.000000e+00 : f32
      %129 = vector.broadcast %cst_138 : f32 to vector<8x128xf32>
      %c0_139 = arith.constant 0 : index
      %c0_140 = arith.constant 0 : index
      %130 = vector.load %arg20[%c0_139, %c0_140] : memref<24x128xf32, #tpu.memory_space<vmem>>, vector<8x128xf32>
      tpu.vector_store %arg20[%c0_139, %c0_140], %129 {strides = array<i32>} : memref<24x128xf32, #tpu.memory_space<vmem>>, vector<8x128xf32>,
      %cst_141 = arith.constant 0.000000e+00 : f32
      %131 = vector.broadcast %cst_141 : f32 to vector<8x128xf32>
      %c0_142 = arith.constant 0 : index
      %c0_143 = arith.constant 0 : index
      %132 = vector.load %arg21[%c0_142, %c0_143] : memref<24x128xf32, #tpu.memory_space<vmem>>, vector<8x128xf32>
      tpu.vector_store %arg21[%c0_142, %c0_143], %131 {strides = array<i32>} : memref<24x128xf32, #tpu.memory_space<vmem>>, vector<8x128xf32>,
      %cst_144 = arith.constant 0.000000e+00 : f32
      %133 = vector.broadcast %cst_144 : f32 to vector<8x128xf32>
      %c0_145 = arith.constant 0 : index
      %c0_146 = arith.constant 0 : index
      %134 = vector.load %arg22[%c0_145, %c0_146] : memref<24x128xf32, #tpu.memory_space<vmem>>, vector<8x128xf32>
      tpu.vector_store %arg22[%c0_145, %c0_146], %133 {strides = array<i32>} : memref<24x128xf32, #tpu.memory_space<vmem>>, vector<8x128xf32>,
      %cst_147 = arith.constant 0.000000e+00 : f32
      %135 = vector.broadcast %cst_147 : f32 to vector<8x128xf32>
      %c0_148 = arith.constant 0 : index
      %c0_149 = arith.constant 0 : index
      %136 = vector.load %arg23[%c0_148, %c0_149] : memref<24x128xf32, #tpu.memory_space<vmem>>, vector<8x128xf32>
      tpu.vector_store %arg23[%c0_148, %c0_149], %135 {strides = array<i32>} : memref<24x128xf32, #tpu.memory_space<vmem>>, vector<8x128xf32>,
      %cst_150 = arith.constant 0.000000e+00 : f32
      %137 = vector.broadcast %cst_150 : f32 to vector<8x128xf32>
      %c0_151 = arith.constant 0 : index
      %c0_152 = arith.constant 0 : index
      %138 = vector.load %arg24[%c0_151, %c0_152] : memref<24x128xf32, #tpu.memory_space<vmem>>, vector<8x128xf32>
      tpu.vector_store %arg24[%c0_151, %c0_152], %137 {strides = array<i32>} : memref<24x128xf32, #tpu.memory_space<vmem>>, vector<8x128xf32>,
      %cst_153 = arith.constant 0.000000e+00 : f32
      %139 = vector.broadcast %cst_153 : f32 to vector<8x128xf32>
      %c0_154 = arith.constant 0 : index
      %c0_155 = arith.constant 0 : index
      %140 = vector.load %arg25[%c0_154, %c0_155] : memref<24x128xf32, #tpu.memory_space<vmem>>, vector<8x128xf32>
      tpu.vector_store %arg25[%c0_154, %c0_155], %139 {strides = array<i32>} : memref<24x128xf32, #tpu.memory_space<vmem>>, vector<8x128xf32>,
    } else {
    }
    %c0 = arith.constant 0 : index
    %c0_1 = arith.constant 0 : index
    %c0_2 = arith.constant 0 : index
    %3 = vector.load %arg2[%c0, %c0_1, %c0_2] : memref<1x16x128xf32, #tpu.memory_space<vmem>>, vector<1x16x128xf32>
    %4 = vector.shape_cast %3 : vector<1x16x128xf32> to vector<16x128xf32>
    %c8 = arith.constant 8 : index
    %c0_3 = arith.constant 0 : index
    %5 = vector.load %arg20[%c8, %c0_3] : memref<24x128xf32, #tpu.memory_space<vmem>>, vector<16x128xf32>
    tpu.vector_store %arg20[%c8, %c0_3], %4 {strides = array<i32>} : memref<24x128xf32, #tpu.memory_space<vmem>>, vector<16x128xf32>,
    %c7 = arith.constant 7 : index
    %c0_4 = arith.constant 0 : index
    %6 = vector.load %arg20[%c7, %c0_4] : memref<24x128xf32, #tpu.memory_space<vmem>>, vector<16x128xf32>
    %c0_5 = arith.constant 0 : index
    %c0_6 = arith.constant 0 : index
    %c0_7 = arith.constant 0 : index
    %7 = vector.load %arg3[%c0_5, %c0_6, %c0_7] : memref<2x128x128xf32, #tpu.memory_space<vmem>>, vector<1x128x128xf32>
    %8 = vector.shape_cast %7 : vector<1x128x128xf32> to vector<128x128xf32>
    %cst = arith.constant dense<0.000000e+00> : vector<16x128xf32>
    %9 = tpu.matmul %6, %8, %cst {dimension_numbers = #tpu.dot_dimension_numbers<[1], [0], [0], [1], [0, 0, 1, 1], [], []>} : vector<16x128xf32>, vector<128x128xf32>, vector<16x128xf32> -> vector<16x128xf32>
    %c8_8 = arith.constant 8 : index
    %c0_9 = arith.constant 0 : index
    %10 = vector.load %arg20[%c8_8, %c0_9] : memref<24x128xf32, #tpu.memory_space<vmem>>, vector<16x128xf32>
    %c1 = arith.constant 1 : index
    %c0_10 = arith.constant 0 : index
    %c0_11 = arith.constant 0 : index
    %11 = vector.load %arg3[%c1, %c0_10, %c0_11] : memref<2x128x128xf32, #tpu.memory_space<vmem>>, vector<1x128x128xf32>
    %12 = vector.shape_cast %11 : vector<1x128x128xf32> to vector<128x128xf32>
    %cst_12 = arith.constant dense<0.000000e+00> : vector<16x128xf32>
    %13 = tpu.matmul %10, %12, %cst_12 {dimension_numbers = #tpu.dot_dimension_numbers<[1], [0], [0], [1], [0, 0, 1, 1], [], []>} : vector<16x128xf32>, vector<128x128xf32>, vector<16x128xf32> -> vector<16x128xf32>
    %14 = arith.addf %9, %13 : vector<16x128xf32>
    %c0_13 = arith.constant 0 : index
    %c0_14 = arith.constant 0 : index
    %15 = vector.load %arg4[%c0_13, %c0_14] : memref<1x128xf32, #tpu.memory_space<vmem>>, vector<1x128xf32>
    %16 = vector.broadcast %15 : vector<1x128xf32> to vector<16x128xf32>
    %17 = arith.addf %14, %16 : vector<16x128xf32>
    %cst_15 = arith.constant 0.000000e+00 : f32
    %18 = vector.broadcast %cst_15 : f32 to vector<16x128xf32>
    %19 = arith.maximumf %17, %18 : vector<16x128xf32>
    %c8_16 = arith.constant 8 : index
    %c0_17 = arith.constant 0 : index
    %20 = vector.load %arg21[%c8_16, %c0_17] : memref<24x128xf32, #tpu.memory_space<vmem>>, vector<16x128xf32>
    tpu.vector_store %arg21[%c8_16, %c0_17], %19 {strides = array<i32>} : memref<24x128xf32, #tpu.memory_space<vmem>>, vector<16x128xf32>,
    %c7_18 = arith.constant 7 : index
    %c0_19 = arith.constant 0 : index
    %21 = vector.load %arg21[%c7_18, %c0_19] : memref<24x128xf32, #tpu.memory_space<vmem>>, vector<16x128xf32>
    %c0_20 = arith.constant 0 : index
    %c0_21 = arith.constant 0 : index
    %c0_22 = arith.constant 0 : index
    %22 = vector.load %arg5[%c0_20, %c0_21, %c0_22] : memref<2x128x128xf32, #tpu.memory_space<vmem>>, vector<1x128x128xf32>
    %23 = vector.shape_cast %22 : vector<1x128x128xf32> to vector<128x128xf32>
    %cst_23 = arith.constant dense<0.000000e+00> : vector<16x128xf32>
    %24 = tpu.matmul %21, %23, %cst_23 {dimension_numbers = #tpu.dot_dimension_numbers<[1], [0], [0], [1], [0, 0, 1, 1], [], []>} : vector<16x128xf32>, vector<128x128xf32>, vector<16x128xf32> -> vector<16x128xf32>
    %c8_24 = arith.constant 8 : index
    %c0_25 = arith.constant 0 : index
    %25 = vector.load %arg21[%c8_24, %c0_25] : memref<24x128xf32, #tpu.memory_space<vmem>>, vector<16x128xf32>
    %c1_26 = arith.constant 1 : index
    %c0_27 = arith.constant 0 : index
    %c0_28 = arith.constant 0 : index
    %26 = vector.load %arg5[%c1_26, %c0_27, %c0_28] : memref<2x128x128xf32, #tpu.memory_space<vmem>>, vector<1x128x128xf32>
    %27 = vector.shape_cast %26 : vector<1x128x128xf32> to vector<128x128xf32>
    %cst_29 = arith.constant dense<0.000000e+00> : vector<16x128xf32>
    %28 = tpu.matmul %25, %27, %cst_29 {dimension_numbers = #tpu.dot_dimension_numbers<[1], [0], [0], [1], [0, 0, 1, 1], [], []>} : vector<16x128xf32>, vector<128x128xf32>, vector<16x128xf32> -> vector<16x128xf32>
    %29 = arith.addf %24, %28 : vector<16x128xf32>
    %c0_30 = arith.constant 0 : index
    %c0_31 = arith.constant 0 : index
    %30 = vector.load %arg6[%c0_30, %c0_31] : memref<1x128xf32, #tpu.memory_space<vmem>>, vector<1x128xf32>
    %31 = vector.broadcast %30 : vector<1x128xf32> to vector<16x128xf32>
    %32 = arith.addf %29, %31 : vector<16x128xf32>
    %cst_32 = arith.constant 0.000000e+00 : f32
    %33 = vector.broadcast %cst_32 : f32 to vector<16x128xf32>
    %34 = arith.maximumf %32, %33 : vector<16x128xf32>
    %c0_33 = arith.constant 0 : index
    %c0_34 = arith.constant 0 : index
    %35 = vector.load %arg7[%c0_33, %c0_34] : memref<128x128xf32, #tpu.memory_space<vmem>>, vector<128x128xf32>
    %cst_35 = arith.constant dense<0.000000e+00> : vector<16x128xf32>
    %36 = tpu.matmul %4, %35, %cst_35 {dimension_numbers = #tpu.dot_dimension_numbers<[1], [0], [0], [1], [0, 0, 1, 1], [], []>} : vector<16x128xf32>, vector<128x128xf32>, vector<16x128xf32> -> vector<16x128xf32>
    %c0_36 = arith.constant 0 : index
    %c0_37 = arith.constant 0 : index
    %37 = vector.load %arg8[%c0_36, %c0_37] : memref<1x128xf32, #tpu.memory_space<vmem>>, vector<1x128xf32>
    %38 = vector.broadcast %37 : vector<1x128xf32> to vector<16x128xf32>
    %39 = arith.addf %36, %38 : vector<16x128xf32>
    %40 = arith.addf %34, %39 : vector<16x128xf32>
    %cst_38 = arith.constant 0.000000e+00 : f32
    %41 = vector.broadcast %cst_38 : f32 to vector<16x128xf32>
    %42 = arith.maximumf %40, %41 : vector<16x128xf32>
    %c16 = arith.constant 16 : index
    %c0_39 = arith.constant 0 : index
    %43 = vector.load %arg20[%c16, %c0_39] : memref<24x128xf32, #tpu.memory_space<vmem>>, vector<8x128xf32>
    %c0_40 = arith.constant 0 : index
    %c0_41 = arith.constant 0 : index
    %44 = vector.load %arg20[%c0_40, %c0_41] : memref<24x128xf32, #tpu.memory_space<vmem>>, vector<8x128xf32>
    tpu.vector_store %arg20[%c0_40, %c0_41], %43 {strides = array<i32>} : memref<24x128xf32, #tpu.memory_space<vmem>>, vector<8x128xf32>,
    %c16_42 = arith.constant 16 : index
    %c0_43 = arith.constant 0 : index
    %45 = vector.load %arg21[%c16_42, %c0_43] : memref<24x128xf32, #tpu.memory_space<vmem>>, vector<8x128xf32>
    %c0_44 = arith.constant 0 : index
    %c0_45 = arith.constant 0 : index
    %46 = vector.load %arg21[%c0_44, %c0_45] : memref<24x128xf32, #tpu.memory_space<vmem>>, vector<8x128xf32>
    tpu.vector_store %arg21[%c0_44, %c0_45], %45 {strides = array<i32>} : memref<24x128xf32, #tpu.memory_space<vmem>>, vector<8x128xf32>,
    %c8_46 = arith.constant 8 : index
    %c0_47 = arith.constant 0 : index
    %47 = vector.load %arg22[%c8_46, %c0_47] : memref<24x128xf32, #tpu.memory_space<vmem>>, vector<16x128xf32>
    tpu.vector_store %arg22[%c8_46, %c0_47], %42 {strides = array<i32>} : memref<24x128xf32, #tpu.memory_space<vmem>>, vector<16x128xf32>,
    %c6 = arith.constant 6 : index
    %c0_48 = arith.constant 0 : index
    %48 = vector.load %arg22[%c6, %c0_48] : memref<24x128xf32, #tpu.memory_space<vmem>>, vector<16x128xf32>
    %c0_49 = arith.constant 0 : index
    %c0_50 = arith.constant 0 : index
    %c0_51 = arith.constant 0 : index
    %49 = vector.load %arg9[%c0_49, %c0_50, %c0_51] : memref<2x128x128xf32, #tpu.memory_space<vmem>>, vector<1x128x128xf32>
    %50 = vector.shape_cast %49 : vector<1x128x128xf32> to vector<128x128xf32>
    %cst_52 = arith.constant dense<0.000000e+00> : vector<16x128xf32>
    %51 = tpu.matmul %48, %50, %cst_52 {dimension_numbers = #tpu.dot_dimension_numbers<[1], [0], [0], [1], [0, 0, 1, 1], [], []>} : vector<16x128xf32>, vector<128x128xf32>, vector<16x128xf32> -> vector<16x128xf32>
    %c8_53 = arith.constant 8 : index
    %c0_54 = arith.constant 0 : index
    %52 = vector.load %arg22[%c8_53, %c0_54] : memref<24x128xf32, #tpu.memory_space<vmem>>, vector<16x128xf32>
    %c1_55 = arith.constant 1 : index
    %c0_56 = arith.constant 0 : index
    %c0_57 = arith.constant 0 : index
    %53 = vector.load %arg9[%c1_55, %c0_56, %c0_57] : memref<2x128x128xf32, #tpu.memory_space<vmem>>, vector<1x128x128xf32>
    %54 = vector.shape_cast %53 : vector<1x128x128xf32> to vector<128x128xf32>
    %cst_58 = arith.constant dense<0.000000e+00> : vector<16x128xf32>
    %55 = tpu.matmul %52, %54, %cst_58 {dimension_numbers = #tpu.dot_dimension_numbers<[1], [0], [0], [1], [0, 0, 1, 1], [], []>} : vector<16x128xf32>, vector<128x128xf32>, vector<16x128xf32> -> vector<16x128xf32>
    %56 = arith.addf %51, %55 : vector<16x128xf32>
    %c0_59 = arith.constant 0 : index
    %c0_60 = arith.constant 0 : index
    %57 = vector.load %arg10[%c0_59, %c0_60] : memref<1x128xf32, #tpu.memory_space<vmem>>, vector<1x128xf32>
    %58 = vector.broadcast %57 : vector<1x128xf32> to vector<16x128xf32>
    %59 = arith.addf %56, %58 : vector<16x128xf32>
    %cst_61 = arith.constant 0.000000e+00 : f32
    %60 = vector.broadcast %cst_61 : f32 to vector<16x128xf32>
    %61 = arith.maximumf %59, %60 : vector<16x128xf32>
    %c8_62 = arith.constant 8 : index
    %c0_63 = arith.constant 0 : index
    %62 = vector.load %arg23[%c8_62, %c0_63] : memref<24x128xf32, #tpu.memory_space<vmem>>, vector<16x128xf32>
    tpu.vector_store %arg23[%c8_62, %c0_63], %61 {strides = array<i32>} : memref<24x128xf32, #tpu.memory_space<vmem>>, vector<16x128xf32>,
    %c6_64 = arith.constant 6 : index
    %c0_65 = arith.constant 0 : index
    %63 = vector.load %arg23[%c6_64, %c0_65] : memref<24x128xf32, #tpu.memory_space<vmem>>, vector<16x128xf32>
    %c0_66 = arith.constant 0 : index
    %c0_67 = arith.constant 0 : index
    %c0_68 = arith.constant 0 : index
    %64 = vector.load %arg11[%c0_66, %c0_67, %c0_68] : memref<2x128x128xf32, #tpu.memory_space<vmem>>, vector<1x128x128xf32>
    %65 = vector.shape_cast %64 : vector<1x128x128xf32> to vector<128x128xf32>
    %cst_69 = arith.constant dense<0.000000e+00> : vector<16x128xf32>
    %66 = tpu.matmul %63, %65, %cst_69 {dimension_numbers = #tpu.dot_dimension_numbers<[1], [0], [0], [1], [0, 0, 1, 1], [], []>} : vector<16x128xf32>, vector<128x128xf32>, vector<16x128xf32> -> vector<16x128xf32>
    %c8_70 = arith.constant 8 : index
    %c0_71 = arith.constant 0 : index
    %67 = vector.load %arg23[%c8_70, %c0_71] : memref<24x128xf32, #tpu.memory_space<vmem>>, vector<16x128xf32>
    %c1_72 = arith.constant 1 : index
    %c0_73 = arith.constant 0 : index
    %c0_74 = arith.constant 0 : index
    %68 = vector.load %arg11[%c1_72, %c0_73, %c0_74] : memref<2x128x128xf32, #tpu.memory_space<vmem>>, vector<1x128x128xf32>
    %69 = vector.shape_cast %68 : vector<1x128x128xf32> to vector<128x128xf32>
    %cst_75 = arith.constant dense<0.000000e+00> : vector<16x128xf32>
    %70 = tpu.matmul %67, %69, %cst_75 {dimension_numbers = #tpu.dot_dimension_numbers<[1], [0], [0], [1], [0, 0, 1, 1], [], []>} : vector<16x128xf32>, vector<128x128xf32>, vector<16x128xf32> -> vector<16x128xf32>
    %71 = arith.addf %66, %70 : vector<16x128xf32>
    %c0_76 = arith.constant 0 : index
    %c0_77 = arith.constant 0 : index
    %72 = vector.load %arg12[%c0_76, %c0_77] : memref<1x128xf32, #tpu.memory_space<vmem>>, vector<1x128xf32>
    %73 = vector.broadcast %72 : vector<1x128xf32> to vector<16x128xf32>
    %74 = arith.addf %71, %73 : vector<16x128xf32>
    %cst_78 = arith.constant 0.000000e+00 : f32
    %75 = vector.broadcast %cst_78 : f32 to vector<16x128xf32>
    %76 = arith.maximumf %74, %75 : vector<16x128xf32>
    %77 = arith.addf %76, %42 : vector<16x128xf32>
    %cst_79 = arith.constant 0.000000e+00 : f32
    %78 = vector.broadcast %cst_79 : f32 to vector<16x128xf32>
    %79 = arith.maximumf %77, %78 : vector<16x128xf32>
    %c16_80 = arith.constant 16 : index
    %c0_81 = arith.constant 0 : index
    %80 = vector.load %arg22[%c16_80, %c0_81] : memref<24x128xf32, #tpu.memory_space<vmem>>, vector<8x128xf32>
    %c0_82 = arith.constant 0 : index
    %c0_83 = arith.constant 0 : index
    %81 = vector.load %arg22[%c0_82, %c0_83] : memref<24x128xf32, #tpu.memory_space<vmem>>, vector<8x128xf32>
    tpu.vector_store %arg22[%c0_82, %c0_83], %80 {strides = array<i32>} : memref<24x128xf32, #tpu.memory_space<vmem>>, vector<8x128xf32>,
    %c16_84 = arith.constant 16 : index
    %c0_85 = arith.constant 0 : index
    %82 = vector.load %arg23[%c16_84, %c0_85] : memref<24x128xf32, #tpu.memory_space<vmem>>, vector<8x128xf32>
    %c0_86 = arith.constant 0 : index
    %c0_87 = arith.constant 0 : index
    %83 = vector.load %arg23[%c0_86, %c0_87] : memref<24x128xf32, #tpu.memory_space<vmem>>, vector<8x128xf32>
    tpu.vector_store %arg23[%c0_86, %c0_87], %82 {strides = array<i32>} : memref<24x128xf32, #tpu.memory_space<vmem>>, vector<8x128xf32>,
    %c8_88 = arith.constant 8 : index
    %c0_89 = arith.constant 0 : index
    %84 = vector.load %arg24[%c8_88, %c0_89] : memref<24x128xf32, #tpu.memory_space<vmem>>, vector<16x128xf32>
    tpu.vector_store %arg24[%c8_88, %c0_89], %79 {strides = array<i32>} : memref<24x128xf32, #tpu.memory_space<vmem>>, vector<16x128xf32>,
    %c4 = arith.constant 4 : index
    %c0_90 = arith.constant 0 : index
    %85 = vector.load %arg24[%c4, %c0_90] : memref<24x128xf32, #tpu.memory_space<vmem>>, vector<16x128xf32>
    %c0_91 = arith.constant 0 : index
    %c0_92 = arith.constant 0 : index
    %c0_93 = arith.constant 0 : index
    %86 = vector.load %arg13[%c0_91, %c0_92, %c0_93] : memref<2x128x128xf32, #tpu.memory_space<vmem>>, vector<1x128x128xf32>
    %87 = vector.shape_cast %86 : vector<1x128x128xf32> to vector<128x128xf32>
    %cst_94 = arith.constant dense<0.000000e+00> : vector<16x128xf32>
    %88 = tpu.matmul %85, %87, %cst_94 {dimension_numbers = #tpu.dot_dimension_numbers<[1], [0], [0], [1], [0, 0, 1, 1], [], []>} : vector<16x128xf32>, vector<128x128xf32>, vector<16x128xf32> -> vector<16x128xf32>
    %c8_95 = arith.constant 8 : index
    %c0_96 = arith.constant 0 : index
    %89 = vector.load %arg24[%c8_95, %c0_96] : memref<24x128xf32, #tpu.memory_space<vmem>>, vector<16x128xf32>
    %c1_97 = arith.constant 1 : index
    %c0_98 = arith.constant 0 : index
    %c0_99 = arith.constant 0 : index
    %90 = vector.load %arg13[%c1_97, %c0_98, %c0_99] : memref<2x128x128xf32, #tpu.memory_space<vmem>>, vector<1x128x128xf32>
    %91 = vector.shape_cast %90 : vector<1x128x128xf32> to vector<128x128xf32>
    %cst_100 = arith.constant dense<0.000000e+00> : vector<16x128xf32>
    %92 = tpu.matmul %89, %91, %cst_100 {dimension_numbers = #tpu.dot_dimension_numbers<[1], [0], [0], [1], [0, 0, 1, 1], [], []>} : vector<16x128xf32>, vector<128x128xf32>, vector<16x128xf32> -> vector<16x128xf32>
    %93 = arith.addf %88, %92 : vector<16x128xf32>
    %c0_101 = arith.constant 0 : index
    %c0_102 = arith.constant 0 : index
    %94 = vector.load %arg14[%c0_101, %c0_102] : memref<1x128xf32, #tpu.memory_space<vmem>>, vector<1x128xf32>
    %95 = vector.broadcast %94 : vector<1x128xf32> to vector<16x128xf32>
    %96 = arith.addf %93, %95 : vector<16x128xf32>
    %cst_103 = arith.constant 0.000000e+00 : f32
    %97 = vector.broadcast %cst_103 : f32 to vector<16x128xf32>
    %98 = arith.maximumf %96, %97 : vector<16x128xf32>
    %c8_104 = arith.constant 8 : index
    %c0_105 = arith.constant 0 : index
    %99 = vector.load %arg25[%c8_104, %c0_105] : memref<24x128xf32, #tpu.memory_space<vmem>>, vector<16x128xf32>
    tpu.vector_store %arg25[%c8_104, %c0_105], %98 {strides = array<i32>} : memref<24x128xf32, #tpu.memory_space<vmem>>, vector<16x128xf32>,
    %c4_106 = arith.constant 4 : index
    %c0_107 = arith.constant 0 : index
    %100 = vector.load %arg25[%c4_106, %c0_107] : memref<24x128xf32, #tpu.memory_space<vmem>>, vector<16x128xf32>
    %c0_108 = arith.constant 0 : index
    %c0_109 = arith.constant 0 : index
    %c0_110 = arith.constant 0 : index
    %101 = vector.load %arg15[%c0_108, %c0_109, %c0_110] : memref<2x128x128xf32, #tpu.memory_space<vmem>>, vector<1x128x128xf32>
    %102 = vector.shape_cast %101 : vector<1x128x128xf32> to vector<128x128xf32>
    %cst_111 = arith.constant dense<0.000000e+00> : vector<16x128xf32>
    %103 = tpu.matmul %100, %102, %cst_111 {dimension_numbers = #tpu.dot_dimension_numbers<[1], [0], [0], [1], [0, 0, 1, 1], [], []>} : vector<16x128xf32>, vector<128x128xf32>, vector<16x128xf32> -> vector<16x128xf32>
    %c8_112 = arith.constant 8 : index
    %c0_113 = arith.constant 0 : index
    %104 = vector.load %arg25[%c8_112, %c0_113] : memref<24x128xf32, #tpu.memory_space<vmem>>, vector<16x128xf32>
    %c1_114 = arith.constant 1 : index
    %c0_115 = arith.constant 0 : index
    %c0_116 = arith.constant 0 : index
    %105 = vector.load %arg15[%c1_114, %c0_115, %c0_116] : memref<2x128x128xf32, #tpu.memory_space<vmem>>, vector<1x128x128xf32>
    %106 = vector.shape_cast %105 : vector<1x128x128xf32> to vector<128x128xf32>
    %cst_117 = arith.constant dense<0.000000e+00> : vector<16x128xf32>
    %107 = tpu.matmul %104, %106, %cst_117 {dimension_numbers = #tpu.dot_dimension_numbers<[1], [0], [0], [1], [0, 0, 1, 1], [], []>} : vector<16x128xf32>, vector<128x128xf32>, vector<16x128xf32> -> vector<16x128xf32>
    %108 = arith.addf %103, %107 : vector<16x128xf32>
    %c0_118 = arith.constant 0 : index
    %c0_119 = arith.constant 0 : index
    %109 = vector.load %arg16[%c0_118, %c0_119] : memref<1x128xf32, #tpu.memory_space<vmem>>, vector<1x128xf32>
    %110 = vector.broadcast %109 : vector<1x128xf32> to vector<16x128xf32>
    %111 = arith.addf %108, %110 : vector<16x128xf32>
    %cst_120 = arith.constant 0.000000e+00 : f32
    %112 = vector.broadcast %cst_120 : f32 to vector<16x128xf32>
    %113 = arith.maximumf %111, %112 : vector<16x128xf32>
    %c0_121 = arith.constant 0 : index
    %c0_122 = arith.constant 0 : index
    %114 = vector.load %arg17[%c0_121, %c0_122] : memref<128x128xf32, #tpu.memory_space<vmem>>, vector<128x128xf32>
    %cst_123 = arith.constant dense<0.000000e+00> : vector<16x128xf32>
    %115 = tpu.matmul %79, %114, %cst_123 {dimension_numbers = #tpu.dot_dimension_numbers<[1], [0], [0], [1], [0, 0, 1, 1], [], []>} : vector<16x128xf32>, vector<128x128xf32>, vector<16x128xf32> -> vector<16x128xf32>
    %c0_124 = arith.constant 0 : index
    %c0_125 = arith.constant 0 : index
    %116 = vector.load %arg18[%c0_124, %c0_125] : memref<1x128xf32, #tpu.memory_space<vmem>>, vector<1x128xf32>
    %117 = vector.broadcast %116 : vector<1x128xf32> to vector<16x128xf32>
    %118 = arith.addf %115, %117 : vector<16x128xf32>
    %119 = arith.addf %113, %118 : vector<16x128xf32>
    %cst_126 = arith.constant 0.000000e+00 : f32
    %120 = vector.broadcast %cst_126 : f32 to vector<16x128xf32>
    %121 = arith.maximumf %119, %120 : vector<16x128xf32>
    %c16_127 = arith.constant 16 : index
    %c0_128 = arith.constant 0 : index
    %122 = vector.load %arg24[%c16_127, %c0_128] : memref<24x128xf32, #tpu.memory_space<vmem>>, vector<8x128xf32>
    %c0_129 = arith.constant 0 : index
    %c0_130 = arith.constant 0 : index
    %123 = vector.load %arg24[%c0_129, %c0_130] : memref<24x128xf32, #tpu.memory_space<vmem>>, vector<8x128xf32>
    tpu.vector_store %arg24[%c0_129, %c0_130], %122 {strides = array<i32>} : memref<24x128xf32, #tpu.memory_space<vmem>>, vector<8x128xf32>,
    %c16_131 = arith.constant 16 : index
    %c0_132 = arith.constant 0 : index
    %124 = vector.load %arg25[%c16_131, %c0_132] : memref<24x128xf32, #tpu.memory_space<vmem>>, vector<8x128xf32>
    %c0_133 = arith.constant 0 : index
    %c0_134 = arith.constant 0 : index
    %125 = vector.load %arg25[%c0_133, %c0_134] : memref<24x128xf32, #tpu.memory_space<vmem>>, vector<8x128xf32>
    tpu.vector_store %arg25[%c0_133, %c0_134], %124 {strides = array<i32>} : memref<24x128xf32, #tpu.memory_space<vmem>>, vector<8x128xf32>,
    %c0_135 = arith.constant 0 : index
    %c0_136 = arith.constant 0 : index
    %c0_137 = arith.constant 0 : index
    %126 = vector.load %arg19[%c0_135, %c0_136, %c0_137] : memref<1x16x128xf32, #tpu.memory_space<vmem>>, vector<1x16x128xf32>
    %127 = vector.shape_cast %126 : vector<1x16x128xf32> to vector<16x128xf32>
    %128 = vector.shape_cast %121 : vector<16x128xf32> to vector<1x16x128xf32>
    tpu.vector_store %arg19[%c0_135, %c0_136, %c0_137], %128 {strides = array<i32>} : memref<1x16x128xf32, #tpu.memory_space<vmem>>, vector<1x16x128xf32>,
    return
  }
  func.func @transform_0(%arg0: i32, %arg1: i32) -> (i32, i32, i32) {
    %c0_i32 = arith.constant 0 : i32
    %c0_i32_0 = arith.constant 0 : i32
    return %arg0, %arg1, %c0_i32 : i32, i32, i32
  }
  func.func @transform_1(%arg0: i32, %arg1: i32) -> (i32, i32, i32) {
    %c0_i32 = arith.constant 0 : i32
    %c0_i32_0 = arith.constant 0 : i32
    %c0_i32_1 = arith.constant 0 : i32
    %c0_i32_2 = arith.constant 0 : i32
    return %c0_i32, %c0_i32_0, %c0_i32_1 : i32, i32, i32
  }
  func.func @transform_2(%arg0: i32, %arg1: i32) -> (i32, i32) {
    %c0_i32 = arith.constant 0 : i32
    %c0_i32_0 = arith.constant 0 : i32
    %c0_i32_1 = arith.constant 0 : i32
    return %c0_i32, %c0_i32_0 : i32, i32
  }
  func.func @transform_3(%arg0: i32, %arg1: i32) -> (i32, i32, i32) {
    %c0_i32 = arith.constant 0 : i32
    %c0_i32_0 = arith.constant 0 : i32
    %c0_i32_1 = arith.constant 0 : i32
    %c0_i32_2 = arith.constant 0 : i32
    return %c0_i32, %c0_i32_0, %c0_i32_1 : i32, i32, i32
  }
  func.func @transform_4(%arg0: i32, %arg1: i32) -> (i32, i32) {
    %c0_i32 = arith.constant 0 : i32
    %c0_i32_0 = arith.constant 0 : i32
    %c0_i32_1 = arith.constant 0 : i32
    return %c0_i32, %c0_i32_0 : i32, i32
  }
  func.func @transform_5(%arg0: i32, %arg1: i32) -> (i32, i32) {
    %c0_i32 = arith.constant 0 : i32
    %c0_i32_0 = arith.constant 0 : i32
    %c0_i32_1 = arith.constant 0 : i32
    return %c0_i32, %c0_i32_0 : i32, i32
  }
  func.func @transform_6(%arg0: i32, %arg1: i32) -> (i32, i32) {
    %c0_i32 = arith.constant 0 : i32
    %c0_i32_0 = arith.constant 0 : i32
    %c0_i32_1 = arith.constant 0 : i32
    return %c0_i32, %c0_i32_0 : i32, i32
  }
  func.func @transform_7(%arg0: i32, %arg1: i32) -> (i32, i32, i32) {
    %c0_i32 = arith.constant 0 : i32
    %c0_i32_0 = arith.constant 0 : i32
    %c0_i32_1 = arith.constant 0 : i32
    %c0_i32_2 = arith.constant 0 : i32
    return %c0_i32, %c0_i32_0, %c0_i32_1 : i32, i32, i32
  }
  func.func @transform_8(%arg0: i32, %arg1: i32) -> (i32, i32) {
    %c0_i32 = arith.constant 0 : i32
    %c0_i32_0 = arith.constant 0 : i32
    %c0_i32_1 = arith.constant 0 : i32
    return %c0_i32, %c0_i32_0 : i32, i32
  }
  func.func @transform_9(%arg0: i32, %arg1: i32) -> (i32, i32, i32) {
    %c0_i32 = arith.constant 0 : i32
    %c0_i32_0 = arith.constant 0 : i32
    %c0_i32_1 = arith.constant 0 : i32
    %c0_i32_2 = arith.constant 0 : i32
    return %c0_i32, %c0_i32_0, %c0_i32_1 : i32, i32, i32
  }
  func.func @transform_10(%arg0: i32, %arg1: i32) -> (i32, i32) {
    %c0_i32 = arith.constant 0 : i32
    %c0_i32_0 = arith.constant 0 : i32
    %c0_i32_1 = arith.constant 0 : i32
    return %c0_i32, %c0_i32_0 : i32, i32
  }
  func.func @transform_11(%arg0: i32, %arg1: i32) -> (i32, i32, i32) {
    %c0_i32 = arith.constant 0 : i32
    %c0_i32_0 = arith.constant 0 : i32
    %c0_i32_1 = arith.constant 0 : i32
    %c0_i32_2 = arith.constant 0 : i32
    return %c0_i32, %c0_i32_0, %c0_i32_1 : i32, i32, i32
  }
  func.func @transform_12(%arg0: i32, %arg1: i32) -> (i32, i32) {
    %c0_i32 = arith.constant 0 : i32
    %c0_i32_0 = arith.constant 0 : i32
    %c0_i32_1 = arith.constant 0 : i32
    return %c0_i32, %c0_i32_0 : i32, i32
  }
  func.func @transform_13(%arg0: i32, %arg1: i32) -> (i32, i32, i32) {
    %c0_i32 = arith.constant 0 : i32
    %c0_i32_0 = arith.constant 0 : i32
    %c0_i32_1 = arith.constant 0 : i32
    %c0_i32_2 = arith.constant 0 : i32
    return %c0_i32, %c0_i32_0, %c0_i32_1 : i32, i32, i32
  }
  func.func @transform_14(%arg0: i32, %arg1: i32) -> (i32, i32) {
    %c0_i32 = arith.constant 0 : i32
    %c0_i32_0 = arith.constant 0 : i32
    %c0_i32_1 = arith.constant 0 : i32
    return %c0_i32, %c0_i32_0 : i32, i32
  }
  func.func @transform_15(%arg0: i32, %arg1: i32) -> (i32, i32) {
    %c0_i32 = arith.constant 0 : i32
    %c0_i32_0 = arith.constant 0 : i32
    %c0_i32_1 = arith.constant 0 : i32
    return %c0_i32, %c0_i32_0 : i32, i32
  }
  func.func @transform_16(%arg0: i32, %arg1: i32) -> (i32, i32) {
    %c0_i32 = arith.constant 0 : i32
    %c0_i32_0 = arith.constant 0 : i32
    %c0_i32_1 = arith.constant 0 : i32
    return %c0_i32, %c0_i32_0 : i32, i32
  }
  func.func @transform_17(%arg0: i32, %arg1: i32) -> (i32, i32, i32) {
    %c0_i32 = arith.constant 0 : i32
    %c0_i32_0 = arith.constant 0 : i32
    return %arg0, %arg1, %c0_i32 : i32, i32, i32
  }
}

</mosaic_0001>

<bundles_post_ra>
// kernel: tpu_custom_call.1
= control target key start
LH: loop header
LB: loop body
LE: loop exit
PB: predicated region body
PF: predicated region fallthrough
CT: control target
= control target key end

     0   :  { %s2623_s0 = inlined_call_operand.hbm [shape: f32[2,16,128], index: 0, kind: input, shape index: {}]   ;;  %s2624_s1 = inlined_call_operand.hbm [shape: f32[2,128,128], index: 1, kind: input, shape index: {}]   ;;  %s2625_s2 = inlined_call_operand.vmem [shape: f32[1,128], index: 2, kind: input, shape index: {}]   ;;  %s2626_s3 = inlined_call_operand.hbm [shape: f32[2,128,128], index: 3, kind: input, shape index: {}]   ;;  %s2627_s4 = inlined_call_operand.vmem [shape: f32[1,128], index: 4, kind: input, shape index: {}]   ;;  %s2628_s5 = inlined_call_operand.hbm [shape: f32[128,128], index: 5, kind: input, shape index: {}]   ;;  %s2629_s6 = inlined_call_operand.vmem [shape: f32[1,128], index: 6, kind: input, shape index: {}]   ;;  %s2630_s7 = inlined_call_operand.hbm [shape: f32[2,128,128], index: 7, kind: input, shape index: {}]   ;;  %s2631_s8 = inlined_call_operand.vmem [shape: f32[1,128], index: 8, kind: input, shape index: {}]   ;;  %s2632_s9 = inlined_call_operand.hbm [shape: f32[2,128,128], index: 9, kind: input, shape index: {}]   ;;  %s2633_s10 = inlined_call_operand.vmem [shape: f32[1,128], index: 10, kind: input, shape index: {}]   ;;  %s2634_s11 = inlined_call_operand.hbm [shape: f32[2,128,128], index: 11, kind: input, shape index: {}]   ;;  %s2635_s12 = inlined_call_operand.vmem [shape: f32[1,128], index: 12, kind: input, shape index: {}]   ;;  %s2636_s13 = inlined_call_operand.hbm [shape: f32[2,128,128], index: 13, kind: input, shape index: {}]   ;;  %s2637_s14 = inlined_call_operand.vmem [shape: f32[1,128], index: 14, kind: input, shape index: {}]   ;;  %s2638_s15 = inlined_call_operand.hbm [shape: f32[128,128], index: 15, kind: input, shape index: {}]   ;;  %s2639_s16 = inlined_call_operand.vmem [shape: f32[1,128], index: 16, kind: input, shape index: {}]   ;;  %s2640_s17 = inlined_call_operand.hbm [shape: f32[2,16,128], index: 17, kind: output, shape index: {}]  }
   0x1   :  { %2645 = sst [smem:[#allocation31_spill]] %s2623_s0 }
   0x2   :  { %2646 = sst [smem:[#allocation32_spill]] %s2624_s1 }
   0x3   :  { %2647 = sst [smem:[#allocation33_spill]] %s2626_s3 }
   0x4   :  { %2648 = sst [smem:[#allocation34_spill]] %s2628_s5 }
   0x5   :  { %2649 = sst [smem:[#allocation35_spill]] %s2630_s7 }
   0x6   :  { %2650 = sst [smem:[#allocation36_spill]] %s2631_s8 }
   0x7   :  { %2651 = sst [smem:[#allocation37_spill]] %s2632_s9 }
   0x8   :  { %2652 = sst [smem:[#allocation38_spill]] %s2633_s10 }
   0x9   :  { %2653 = sst [smem:[#allocation39_spill]] %s2634_s11 }
   0xa   :  { %2654 = sst [smem:[#allocation40_spill]] %s2635_s12 }
   0xb   :  { %2655 = sst [smem:[#allocation41_spill]] %s2637_s14 }
   0xc   :  { %2656 = sst [smem:[#allocation42_spill]] %s2639_s16 }
   0xd   :  { %2657 = sst [smem:[#allocation43_spill]] %s2640_s17 }
   0xe   :  { %22 = vsyncpa [#allocation9], 0 }
   0xf   :  { %24 = vsyncpa [#allocation9 + $0x1], 0 }
  0x10   :  { %25 = vsyncpa [#allocation12], 0 }
  0x11   :  { %26 = vsyncpa [#allocation15], 0 }
  0x12   :  { %27 = vsyncpa [#allocation18], 0 }
  0x13   :  { %28 = vsyncpa [#allocation21], 0 }
  0x14   :  { %29 = vsyncpa [#allocation10], 0 }
  0x15   :  { %31 = vsyncpa [#allocation10 + $0x1], 0  ;;  %s2278_s24 = smov 0   ;;  %s2280_s25 = smov 0  }
  0x16   :  { %s2282_s26 = smov 0   ;;  %s2284_s27 = smov 0  }
  0x17   :  { %s2286_s28 = smov 0   ;;  %s2288_s29 = smov 0  }
  0x18 LB: > { %2658 = sst [smem:[#allocation30_spill]] %s2165_s27  ;;  %s2641_s0 = sadd.s32 4294967295, %s2173_s29   ;;  %s2173_s29 = sphi %s2288_s29, %s37_s29   ;;  %s2169_s28 = sphi %s2286_s28, %s2686_s28   ;;  %s2165_s27 = sphi %s2284_s27, %s2685_s27   ;;  %s2161_s26 = sphi %s2282_s26, %s2684_s26   ;;  %s2157_s25 = sphi %s2280_s25, %s2683_s25   ;;  %s2153_s24 = sphi %s2278_s24, %s2682_s24  }
  0x19   : > { %p1586_p0 = scmp.ge.s32.totalorder %s2173_s29, 1  ;;  %p2312_p1 = scmp.eq.s32.totalorder %s2641_s0, 0 }
  0x1a   : > { %p446_p2 = scmp.lt.s32.totalorder %s2173_s29, 3  ;;  %s2660_s1 = sld [smem:[#allocation32_spill]] }
  0x1b   : > { %s2175_s22 = smov [#allocation11]   ;;  %p1595_p6 = scmp.ge.s32.totalorder %s2173_s29, 2 }
  0x1c   : > { %p2320_p3 = pnand %p1586_p0, %p446_p2  ;;  %s459_s23 = sshll.u32 %s2175_s22, 4  ;;  %s460_s23 = int_to_ptr.vmem [resolvable:$true] %s459_s23 }
  0x1d   : > { %s2663_s5 = sld [smem:[#allocation34_spill]]  ;;  %s2643_s17 = smov 128  }
  0x1e   : > { %p1685_p4 = pneg %p2320_p3  ;;  %s2644_s16 = smov 8  }
  0x1f   : > { %s2178_s22 = smov [#allocation14]   ;;  %s2664_s9 = sld [smem:[#allocation37_spill]] }
  0x20   : > { %s457_s20 = sshll.u32 %s2660_s1, 4  ;;  %p2328_p5 = pnand %p1685_p4, %p2312_p1  ;;  %s458_s20 = int_to_ptr.hbm [resolvable:$true] %s457_s20 }
  0x21   : > { %s493_s14 = sshll.u32 %s2178_s22, 4  ;;  %s2179_s8 = smov [#allocation17]   ;;  %s494_s14 = int_to_ptr.vmem [resolvable:$true] %s493_s14 }
  0x22   : > { %1688 = dma.hbm_to_vmem [thread:$0]  (!%p2328_p5), %s458_s20, 4096, %s460_s23, [#allocation12], %s2643_s17, %s2643_s17, %s2644_s16  }
  0x23   : > { %s491_s1 = sshll.u32 %s2663_s5, 4  ;;  %s559_s5 = sshll.u32 %s2636_s13, 4  ;;  %s492_s1 = int_to_ptr.hbm [resolvable:$true] %s491_s1  ;;  %s560_s5 = int_to_ptr.hbm [resolvable:$true] %s559_s5 }
  0x24   : > { %1694 = dma.hbm_to_vmem [thread:$0]  (!%p2328_p5), %s492_s1, 2048, %s494_s14, [#allocation15], %s2643_s17, %s2643_s17, %s2644_s16  }
  0x25   : > { %s525_s10 = sshll.u32 %s2664_s9, 4  ;;  %s527_s20 = sshll.u32 %s2179_s8, 4  ;;  %s526_s10 = int_to_ptr.hbm [resolvable:$true] %s525_s10  ;;  %s528_s20 = int_to_ptr.vmem [resolvable:$true] %s527_s20 }
  0x26   : > { %1700 = dma.hbm_to_vmem [thread:$0]  (!%p2328_p5), %s526_s10, 4096, %s528_s20, [#allocation18], %s2643_s17, %s2643_s17, %s2644_s16  }
  0x27   : > { %s2180_s12 = smov [#allocation20]   ;;  %s2665_s3 = sld [smem:[#allocation33_spill]] }
  0x28   : > { %s561_s27 = sshll.u32 %s2180_s12, 4  ;;  %s2666_s7 = sld [smem:[#allocation35_spill]]  ;;  %s562_s27 = int_to_ptr.vmem [resolvable:$true] %s561_s27 }
  0x29   : > { %1706 = dma.hbm_to_vmem [thread:$0]  (!%p2328_p5), %s560_s5, 4096, %s562_s27, [#allocation21], %s2643_s17, %s2643_s17, %s2644_s16  }
  0x2a   : > { %s2181_s19 = smov [#allocation13]   ;;  %s2182_s20 = smov [#allocation16]  }
  0x2b   : > { %s476_s10 = sshll.u32 %s2181_s19, 4  ;;  %s510_s12 = sshll.u32 %s2182_s20, 4  ;;  %s477_s10 = int_to_ptr.vmem [resolvable:$true] %s476_s10  ;;  %s511_s12 = int_to_ptr.vmem [resolvable:$true] %s510_s12 }
  0x2c   : > { %s2667_s11 = sld [smem:[#allocation39_spill]]  ;;  %s576_s8 = sshll.u32 %s2638_s15, 4  ;;  %s577_s8 = int_to_ptr.hbm [resolvable:$true] %s576_s8 }
  0x2d   : > { %s474_s14 = sshll.u32 %s2665_s3, 4  ;;  %s2183_s1 = smov [#allocation19]   ;;  %s475_s14 = int_to_ptr.hbm [resolvable:$true] %s474_s14 }
  0x2e   : > { %s508_s18 = sshll.u32 %s2666_s7, 4  ;;  %s544_s19 = sshll.u32 %s2183_s1, 4  ;;  %s509_s18 = int_to_ptr.hbm [resolvable:$true] %s508_s18  ;;  %s545_s19 = int_to_ptr.vmem [resolvable:$true] %s544_s19 }
  0x2f   : > { %1691 = dma.hbm_to_vmem [thread:$0]  (!%p2328_p5), %s475_s14, 4096, %s477_s10, [#allocation12], %s2643_s17, %s2643_s17, %s2644_s16  }
  0x30   : > { %1697 = dma.hbm_to_vmem [thread:$0]  (!%p2328_p5), %s509_s18, 4096, %s511_s12, [#allocation15], %s2643_s17, %s2643_s17, %s2644_s16  }
  0x31   : > { %s2184_s18 = smov [#allocation22]   ;;  %s49_s20 = sadd.s32 1, %s2169_s28 }
  0x32   : > { %s542_s27 = sshll.u32 %s2667_s11, 4  ;;  %s578_s10 = sshll.u32 %s2184_s18, 4  ;;  %s543_s27 = int_to_ptr.hbm [resolvable:$true] %s542_s27  ;;  %s579_s10 = int_to_ptr.vmem [resolvable:$true] %s578_s10 }
  0x33   : > { %1703 = dma.hbm_to_vmem [thread:$0]  (!%p2328_p5), %s543_s27, 4096, %s545_s19, [#allocation18], %s2643_s17, %s2643_s17, %s2644_s16  }
  0x34   : > { %1709 = dma.hbm_to_vmem [thread:$0]  (!%p2328_p5), %s577_s8, 2048, %s579_s10, [#allocation21], %s2643_s17, %s2643_s17, %s2644_s16  }
  0x35   : > { %s1585_s12 = sadd.s32 4294967294, %s2173_s29   ;;  %p51_p7 = scmp.ge.s32.totalorder %s49_s20, 2 }
  0x36   : > { %s58_s23 = sadd.s32 1, %s2161_s26  ;;  %p65_p8 = scmp.ne.s32.totalorder %s2161_s26, %s2157_s25 }
  0x37   : > { %s2688_s20 = smov (%p51_p7, %s49_s20), 0  ;;  %p66_p9 = scmp.eq.s32.totalorder %s2173_s29, 0 }
  0x38   : > { %p71_p10 = scmp.ne.s32.totalorder %s2157_s25, %s2153_s24  ;;  %s53_s5 = ssub.s32 %s2169_s28, %s2688_s20 }
  0x39   : > { %s2668_s0 = sadd.s32 4294967295, %s2173_s29   ;;  %p56_p12 = scmp.eq.s32.totalorder %s53_s5, 0 }
  0x3a   : > { %p433_p11 = scmp.eq.s32.totalorder %s2668_s0, 1  ;;  %p2410_p13 = por %p2312_p1, %p71_p10 }
  0x3b   : > { %p439_p2 = scmp.eq.s32.totalorder %s1585_s12, 1  ;;  %p67_p4 = por %p66_p9, %p65_p8 }
  0x3c   : > { %p2414_p0 = por %p433_p11, %p65_p8  ;;  %s595_s1 = sand.u32 1, %s2161_s26  }
  0x3d   : > { %s2419_s14 = scalar_select %p56_p12, %s2161_s26, %s58_s23  }
  0x3e   : > { %p2421_p5 = por %p439_p2, %p71_p10  ;;  %s1615_s19 = sshll.u32 %s2169_s28, 4 }
  0x3f   : > { %p1726_p7 = scmp.lt.s32.totalorder %s2173_s29, 2  ;;  %s1596_s18 = sshll.u32 %s595_s1, 4 }
  0x40   : > { %s2672_s0 = sld [smem:[#allocation31_spill]]  ;;  %s599_s3 = scalar_lea.vmem [#allocation8], %s1596_s18 }
  0x41   : > { %s609_s7 = sshll.u32 %s599_s3, 4  ;;  %p1711_p11 = pnand %p1726_p7, %p67_p4  ;;  %s610_s7 = int_to_ptr.vmem [resolvable:$true] %s609_s7 }
  0x42   : > { %s596_s12 = scalar_lea.sflag [#allocation9], %s595_s1  ;;  %s2673_s23 = smov 8  }
  0x43   : > { %s2674_s9 = smov 128   ;;  %s2437_s11 = sand.u32 (!%p2320_p3), 1, %s2157_s25  }
  0x44   : > { %621 = sbr.rel (%p2320_p3) target bundleno = 996 (0x3e4), region = 88  ;;  %s624_s3 = scalar_lea.sflag (!%p2320_p3), [#allocation9], %s2437_s11 }
  0x46   : > { %s606_s17 = scalar_lea.hbm %s2672_s0, %s1615_s19 }
  0x47   : > { %s607_s16 = sshll.u32 %s606_s17, 4  ;;  %s1600_s17 = sshll.u32 (!%p2320_p3), %s2437_s11, 4  ;;  %s608_s16 = int_to_ptr.hbm [resolvable:$true] %s607_s16 }
  0x48   : > { %1713 = dma.hbm_to_vmem [thread:$0]  (!%p1711_p11), %s608_s16, 256, %s610_s7, %s596_s12, %s2674_s9, %s2674_s9, %s2673_s23  }
  0x49   : > { %s2443_s19 = scalar_lea.vmem [#allocation8], %s1600_s17 }
  0x4a   : > { %2128 = dma.done.wait (%p2410_p13), %s624_s3, 256  }
  0x4b   : > { %2130 = vsyncadd (%p2410_p13), %s624_s3, 4294967040 }
  0x4c   : > { %2132 = dma.done.wait (%p2312_p1), [#allocation12], 8192  }
  0x4d   : > { %2134 = vsyncadd (%p2312_p1), [#allocation12], 4294959104 }
  0x4e   : > { %2136 = dma.done.wait (%p2312_p1), [#allocation15], 6144  }
  0x4f   : > { %2138 = vsyncadd (%p2312_p1), [#allocation15], 4294961152 }
  0x50   : > { %2140 = dma.done.wait (%p2312_p1), [#allocation18], 8192  }
  0x51   : > { %2142 = vsyncadd (%p2312_p1), [#allocation18], 4294959104 }
  0x52   : > { %2144 = dma.done.wait (%p2312_p1), [#allocation21], 6144  }
  0x53   : > { %2146 = vsyncadd (%p2312_p1), [#allocation21], 4294961152  ;;  %v2185_v0 = vmov 0.0   ;;  %v771_v1 = vld [vmem:[#allocation11 + $0xf8] sm:$0xff]  ;;  %v770_v3 = vld [vmem:[#allocation11 + $0xf0] sm:$0xff]  ;;  %s2675_s10 = sld [smem:[#allocation36_spill]] }
  0x54   : > { %725 = vst [vmem:[#allocation2] sm:$0xff] %v2185_v0  ;;  %v752_v2 = vld [vmem:[#allocation11 + $0x78] sm:$0xff]  ;;  %772 = vmatpush.msra.mxu0 %v771_v1  ;;  %v751_v4 = vld [vmem:[#allocation11 + $0x70] sm:$0xff]  ;;  %v769_v5 = vld [vmem:[#allocation11 + $0xe8] sm:$0xff]  ;;  %s2676_s12 = sld [smem:[#allocation38_spill]]  ;;  %s718_s18 = scalar_lea.vmem [#allocation23], %s1600_s17 }
  0x55   : > { %726 = vst [vmem:[#allocation3] sm:$0xff] %v2185_v0  ;;  %795 = vmatpush.msra.mxu1 %v752_v2  ;;  %v750_v6 = vld [vmem:[#allocation11 + $0x68] sm:$0xff]  ;;  %v768_v7 = vld [vmem:[#allocation11 + $0xe0] sm:$0xff]  ;;  %v767_v9 = vld [vmem:[#allocation11 + $0xd8] sm:$0xff]  ;;  %s2678_s7 = sld [smem:[#allocation30_spill]]  ;;  %s1418_s3 = sshll.u32 %s718_s18, 4  ;;  %s1419_s3 = int_to_ptr.vmem [resolvable:$true] %s1418_s3 }
  0x56   : > { %727 = vst [vmem:[#allocation4] sm:$0xff] %v2185_v0  ;;  %773 = vmatpush.msra.mxu0 %v770_v3  ;;  %v749_v8 = vld [vmem:[#allocation11 + $0x60] sm:$0xff]  ;;  %v748_v10 = vld [vmem:[#allocation11 + $0x58] sm:$0xff]  ;;  %v766_v11 = vld [vmem:[#allocation11 + $0xd0] sm:$0xff]  ;;  %s2679_s30 = sld [smem:[#allocation41_spill]]  ;;  %s1404_s17 = scalar_lea.sflag [#allocation10], %s2437_s11 }
  0x57   : > { %728 = vst [vmem:[#allocation5] sm:$0xff] %v2185_v0  ;;  %796 = vmatpush.msra.mxu1 %v751_v4  ;;  %v747_v12 = vld [vmem:[#allocation11 + $0x50] sm:$0xff]  ;;  %v765_v13 = vld [vmem:[#allocation11 + $0xc8] sm:$0xff]  ;;  %v764_v15 = vld [vmem:[#allocation11 + $0xc0] sm:$0xff]  ;;  %s2680_s1 = sld [smem:[#allocation42_spill]] }
  0x58   : > { %729 = vst [vmem:[#allocation6] sm:$0xff] %v2185_v0  ;;  %774 = vmatpush.msra.mxu0 %v769_v5  ;;  %v746_v14 = vld [vmem:[#allocation11 + $0x48] sm:$0xff]  ;;  %v2466_v16 = vld [vmem:[%s2443_s19] sm:$0xff]  ;;  %v864_v18 = vld [vmem:[#allocation13 + $0xf8] sm:$0xff] }
  0x59   : > { %730 = vst [vmem:[#allocation7] sm:$0xff] %v2185_v0  ;;  %797 = vmatpush.msra.mxu1 %v750_v6  ;;  %v2470_v17 = vld [vmem:[%s2443_s19 + $0x8] sm:$0xff]  ;;  %v745_v20 = vld [vmem:[#allocation11 + $0x40] sm:$0xff]  ;;  %865 = vmatpush.msra.mxu2 %v864_v18  ;;  %v863_v21 = vld [vmem:[#allocation13 + $0xf0] sm:$0xff]  ;;  %s2677_s19 = sld [smem:[#allocation40_spill]] }
  0x5a   : > { %775 = vmatpush.msra.mxu0 %v768_v7  ;;  %733 = vst [vmem:[#allocation2 + $0x8] sm:$0xff] %v2466_v16  ;;  %v845_v19 = vld [vmem:[#allocation13 + $0x78] sm:$0xff]  ;;  %v844_v22 = vld [vmem:[#allocation13 + $0x70] sm:$0xff]  ;;  %v862_v23 = vld [vmem:[#allocation13 + $0xe8] sm:$0xff] }
  0x5b   : > { %798 = vmatpush.msra.mxu1 %v749_v8  ;;  %734 = vst [vmem:[#allocation2 + $0x10] sm:$0xff] %v2470_v17  ;;  %888 = vmatpush.msra.mxu3 %v845_v19  ;;  %v843_v24 = vld [vmem:[#allocation13 + $0x68] sm:$0xff]  ;;  %v763_v25 = vld [vmem:[#allocation11 + $0xb8] sm:$0xff]  ;;  %v762_v27 = vld [vmem:[#allocation11 + $0xb0] sm:$0xff] }
  0x5c   : > { %776 = vmatpush.msra.mxu0 %v767_v9  ;;  %v744_v26 = vld [vmem:[#allocation11 + $0x38] sm:$0xff]  ;;  %866 = vmatpush.msra.mxu2 %v863_v21  ;;  %v743_v28 = vld [vmem:[#allocation11 + $0x30] sm:$0xff]  ;;  %v861_v29 = vld [vmem:[#allocation13 + $0xe0] sm:$0xff] }
  0x5d   : > { %799 = vmatpush.msra.mxu1 %v748_v10  ;;  %889 = vmatpush.msra.mxu3 %v844_v22  ;;  %v842_v30 = vld [vmem:[#allocation13 + $0x60] sm:$0xff]  ;;  %v761_v31 = vld [vmem:[#allocation11 + $0xa8] sm:$0xff]  ;;  %v860_v33 = vld [vmem:[#allocation13 + $0xd8] sm:$0xff] }
  0x5e   : > { %777 = vmatpush.msra.mxu0 %v766_v11  ;;  %v742_v32 = vld [vmem:[#allocation11 + $0x28] sm:$0xff]  ;;  %867 = vmatpush.msra.mxu2 %v862_v23  ;;  %v841_v34 = vld [vmem:[#allocation13 + $0x58] sm:$0xff]  ;;  %v859_v35 = vld [vmem:[#allocation13 + $0xd0] sm:$0xff] }
  0x5f   : > { %800 = vmatpush.msra.mxu1 %v747_v12  ;;  %890 = vmatpush.msra.mxu3 %v843_v24  ;;  %v760_v36 = vld [vmem:[#allocation11 + $0xa0] sm:$0xff]  ;;  %v840_v39 = vld [vmem:[#allocation13 + $0x50] sm:$0xff]  ;;  %v858_v40 = vld [vmem:[#allocation13 + $0xc8] sm:$0xff] }
  0x60   : > { %778 = vmatpush.msra.mxu0 %v765_v13  ;;  %v741_v37 = vld [vmem:[#allocation11 + $0x20] sm:$0xff]  ;;  %868 = vmatpush.msra.mxu2 %v861_v29  ;;  %v839_v41 = vld [vmem:[#allocation13 + $0x48] sm:$0xff]  ;;  %v759_v42 = vld [vmem:[#allocation11 + $0x98] sm:$0xff] }
  0x61   : > { %801 = vmatpush.msra.mxu1 %v746_v14  ;;  %v735_v38 = vld [vmem:[#allocation2 + $0x7] sm:$0xff]  ;;  %891 = vmatpush.msra.mxu3 %v842_v30  ;;  %v857_v44 = vld [vmem:[#allocation13 + $0xc0] sm:$0xff]  ;;  %v757_v48 = vld [vmem:[#allocation11 + $0x88] sm:$0xff] }
  0x62   : > { %779 = vmatpush.msra.mxu0 %v764_v15  ;;  %967 = vst [vmem:[#allocation2] sm:$0xff] %v2470_v17  ;;  %869 = vmatpush.msra.mxu2 %v860_v33  ;;  %v740_v43 = vld [vmem:[#allocation11 + $0x18] sm:$0xff]  ;;  %v838_v45 = vld [vmem:[#allocation13 + $0x40] sm:$0xff]  ;;  %v758_v46 = vld [vmem:[#allocation11 + $0x90] sm:$0xff] }
  0x63   : > { %802 = vmatpush.msra.mxu1 %v745_v20  ;;  %892 = vmatpush.msra.mxu3 %v841_v34  ;;  %v739_v47 = vld [vmem:[#allocation11 + $0x10] sm:$0xff]  ;;  %v738_v49 = vld [vmem:[#allocation11 + $0x8] sm:$0xff]  ;;  %v756_v50 = vld [vmem:[#allocation11 + $0x80] sm:$0xff] }
  0x64   : > { %780 = vmatpush.msra.mxu0 %v763_v25  ;;  %870 = vmatpush.msra.mxu2 %v859_v35  ;;  %v737_v51 = vld [vmem:[#allocation11] sm:$0xff]  ;;  %v934_v52 = vld [vmem:[#allocation14 + $0x78] sm:$0xff]  ;;  %v933_v53 = vld [vmem:[#allocation14 + $0x70] sm:$0xff] }
  0x65   : > { %803 = vmatpush.msra.mxu1 %v744_v26  ;;  %893 = vmatpush.msra.mxu3 %v840_v39  ;;  %v932_v54 = vld [vmem:[#allocation14 + $0x68] sm:$0xff]  ;;  %v736_v55 = vld [vmem:[#allocation2 + $0xf] sm:$0xff]  ;;  %v855_v57 = vld [vmem:[#allocation13 + $0xb0] sm:$0xff] }
  0x66   : > { %781 = vmatpush.msra.mxu0 %v762_v27  ;;  %871 = vmatpush.msra.mxu2 %v858_v40  ;;  %v856_v56 = vld [vmem:[#allocation13 + $0xb8] sm:$0xff]  ;;  %v854_v58 = vld [vmem:[#allocation13 + $0xa8] sm:$0xff]  ;;  %v853_v59 = vld [vmem:[#allocation13 + $0xa0] sm:$0xff] }
  0x67   : > { %804 = vmatpush.msra.mxu1 %v743_v28  ;;  %894 = vmatpush.msra.mxu3 %v839_v41  ;;  %v837_v60 = vld [vmem:[#allocation13 + $0x38] sm:$0xff]  ;;  %v931_v61 = vld [vmem:[#allocation14 + $0x60] sm:$0xff]  ;;  %v836_v63 = vld [vmem:[#allocation13 + $0x30] sm:$0xff] }
  0x68   : > { %782 = vmatpush.msra.mxu0 %v761_v31  ;;  %872 = vmatpush.msra.mxu2 %v857_v44  ;;  %v852_v62 = vld [vmem:[#allocation13 + $0x98] sm:$0xff]  ;;  %v851_v1 = vld [vmem:[#allocation13 + $0x90] sm:$0xff]  ;;  %v835_v2 = vld [vmem:[#allocation13 + $0x28] sm:$0xff] }
  0x69   : > { %805 = vmatpush.msra.mxu1 %v742_v32  ;;  %895 = vmatpush.msra.mxu3 %v838_v45  ;;  %v930_v0 = vld [vmem:[#allocation14 + $0x58] sm:$0xff]  ;;  %v929_v3 = vld [vmem:[#allocation14 + $0x50] sm:$0xff]  ;;  %v850_v4 = vld [vmem:[#allocation13 + $0x88] sm:$0xff] }
  0x6a   : > { %783 = vmatpush.msra.mxu0 %v760_v36  ;;  %873 = vmatpush.msra.mxu2 %v856_v56  ;;  %v834_v5 = vld [vmem:[#allocation13 + $0x20] sm:$0xff]  ;;  %v928_v6 = vld [vmem:[#allocation14 + $0x48] sm:$0xff]  ;;  %v833_v8 = vld [vmem:[#allocation13 + $0x18] sm:$0xff] }
  0x6b   : > { %806 = vmatpush.msra.mxu1 %v741_v37  ;;  %896 = vmatpush.msra.mxu3 %v837_v60  ;;  %v849_v7 = vld [vmem:[#allocation13 + $0x80] sm:$0xff]  ;;  %v832_v10 = vld [vmem:[#allocation13 + $0x10] sm:$0xff]  ;;  %v926_v11 = vld [vmem:[#allocation14 + $0x38] sm:$0xff] }
  0x6c   : > { %784 = vmatpush.msra.mxu0 %v759_v42  ;;  %874 = vmatpush.msra.mxu2 %v855_v57  ;;  %v927_v9 = vld [vmem:[#allocation14 + $0x40] sm:$0xff]  ;;  %v831_v12 = vld [vmem:[#allocation13 + $0x8] sm:$0xff]  ;;  %v925_v13 = vld [vmem:[#allocation14 + $0x30] sm:$0xff] }
  0x6d   : > { %807 = vmatpush.msra.mxu1 %v740_v43  ;;  %897 = vmatpush.msra.mxu3 %v836_v63  ;;  %v830_v14 = vld [vmem:[#allocation13] sm:$0xff]  ;;  %v924_v15 = vld [vmem:[#allocation14 + $0x28] sm:$0xff]  ;;  %v922_v19 = vld [vmem:[#allocation14 + $0x18] sm:$0xff] }
  0x6e   : > { %785 = vmatpush.msra.mxu0 %v758_v46  ;;  %875 = vmatpush.msra.mxu2 %v854_v58  ;;  %v923_v18 = vld [vmem:[#allocation14 + $0x20] sm:$0xff]  ;;  %v921_v20 = vld [vmem:[#allocation14 + $0x10] sm:$0xff]  ;;  %v920_v21 = vld [vmem:[#allocation14 + $0x8] sm:$0xff] }
  0x6f   : > { %808 = vmatpush.msra.mxu1 %v739_v47  ;;  %898 = vmatpush.msra.mxu3 %v835_v2  ;;  %v919_v22 = vld [vmem:[#allocation14] sm:$0xff]  ;;  %v1008_v23 = vld [vmem:[#allocation16 + $0xf8] sm:$0xff]  ;;  %v1007_v25 = vld [vmem:[#allocation16 + $0xf0] sm:$0xff] }
  0x70   : > { %786 = vmatpush.msra.mxu0 %v757_v48  ;;  %876 = vmatpush.msra.mxu2 %v853_v59  ;;  %v989_v24 = vld [vmem:[#allocation16 + $0x78] sm:$0xff]  ;;  %v988_v26 = vld [vmem:[#allocation16 + $0x70] sm:$0xff]  ;;  %v1006_v27 = vld [vmem:[#allocation16 + $0xe8] sm:$0xff] }
  0x71   : > { %809 = vmatpush.msra.mxu1 %v738_v49  ;;  %899 = vmatpush.msra.mxu3 %v834_v5  ;;  %v987_v28 = vld [vmem:[#allocation16 + $0x68] sm:$0xff]  ;;  %v1005_v29 = vld [vmem:[#allocation16 + $0xe0] sm:$0xff]  ;;  %v1004_v31 = vld [vmem:[#allocation16 + $0xd8] sm:$0xff] }
  0x72   : > { %787 = vmatpush.msra.mxu0 %v756_v50  ;;  %877 = vmatpush.msra.mxu2 %v852_v62  ;;  %v986_v30 = vld [vmem:[#allocation16 + $0x60] sm:$0xff]  ;;  %v985_v32 = vld [vmem:[#allocation16 + $0x58] sm:$0xff]  ;;  %v1797_v33 = vld [vmem:[%s2625_s2] ss:$0 sm:$0xff] }
  0x73   : > { %810 = vmatpush.msra.mxu1 %v737_v51  ;;  %788 = vmatmul.f32.vlgmr.msra.gmra.mxu0 %v2466_v16  ;;  %v1003_v34 = vld [vmem:[#allocation16 + $0xd0] sm:$0xff]  ;;  %v1002_v47 = vld [vmem:[#allocation16 + $0xc8] sm:$0xff]  ;;  %v1000_v48 = vld [vmem:[#allocation16 + $0xb8] sm:$0xff] }
  0x74   : > { %811 = vmatmul.f32.vlgmr.msra.gmra.mxu1 %v735_v38  ;;  %939 = vmatpush.msrb.mxu0 %v934_v52  ;;  %v999_v49 = vld [vmem:[#allocation16 + $0xb0] sm:$0xff]  ;;  %v983_v50 = vld [vmem:[#allocation16 + $0x48] sm:$0xff]  ;;  %v982_v52 = vld [vmem:[#allocation16 + $0x40] sm:$0xff] }
  0x75   : > { %878 = vmatpush.msra.mxu2 %v851_v1  ;;  %900 = vmatpush.msra.mxu3 %v833_v8  ;;  %v998_v51 = vld [vmem:[#allocation16 + $0xa8] sm:$0xff]  ;;  %v980_v56 = vld [vmem:[#allocation16 + $0x30] sm:$0xff]  ;;  %v978_v60 = vld [vmem:[#allocation16 + $0x20] sm:$0xff] }
  0x76   : > { %940 = vmatpush.msrb.mxu0 %v933_v53  ;;  %1009 = vmatpush.msrb.mxu1 %v1008_v23  ;;  %v997_v53 = vld [vmem:[#allocation16 + $0xa0] sm:$0xff]  ;;  %v995_v57 = vld [vmem:[#allocation16 + $0x90] sm:$0xff]  ;;  %v979_v58 = vld [vmem:[#allocation16 + $0x28] sm:$0xff] }
  0x77   : > { %879 = vmatpush.msra.mxu2 %v850_v4  ;;  %901 = vmatpush.msra.mxu3 %v832_v10  ;;  %v994_v59 = vld [vmem:[#allocation16 + $0x88] sm:$0xff]  ;;  %v977_v62 = vld [vmem:[#allocation16 + $0x18] sm:$0xff]  ;;  %v976_v63 = vld [vmem:[#allocation16 + $0x10] sm:$0xff] }
  0x78   : > { %941 = vmatpush.msrb.mxu0 %v932_v54  ;;  %1010 = vmatpush.msrb.mxu1 %v1007_v25  ;;  %v981_v54 = vld [vmem:[#allocation16 + $0x38] sm:$0xff]  ;;  %v974_v1 = vld [vmem:[#allocation16] sm:$0xff]  ;;  %v1100_v4 = vld [vmem:[#allocation17 + $0xf0] sm:$0xff] }
  0x79   : > { %880 = vmatpush.msra.mxu2 %v849_v7  ;;  %902 = vmatpush.msra.mxu3 %v831_v12  ;;  %v1101_v2 = vld [vmem:[#allocation17 + $0xf8] sm:$0xff]  ;;  %v1081_v5 = vld [vmem:[#allocation17 + $0x70] sm:$0xff]  ;;  %v1099_v7 = vld [vmem:[#allocation17 + $0xe8] sm:$0xff] }
  0x7a   : > { %942 = vmatpush.msrb.mxu0 %v931_v61  ;;  %1011 = vmatpush.msrb.mxu1 %v1006_v27  ;;  %v993_v61 = vld [vmem:[#allocation16 + $0x80] sm:$0xff]  ;;  %v1080_v8 = vld [vmem:[#allocation17 + $0x68] sm:$0xff]  ;;  %v1798_v10 = vld [vmem:[%s2627_s4] ss:$0 sm:$0xff] }
  0x7b   : > { %791 = vmatmul.f32.gmra.mxu0 %v2470_v17  ;;  %903 = vmatpush.msra.mxu3 %v830_v14  ;;  %v1098_v12 = vld [vmem:[#allocation17 + $0xe0] sm:$0xff] }
  0x7c   : > { %814 = vmatmul.f32.gmra.mxu1 %v736_v55  ;;  %943 = vmatpush.msrb.mxu0 %v930_v0  ;;  %v996_v55 = vld [vmem:[#allocation16 + $0x98] sm:$0xff]  ;;  %v975_v0 = vld [vmem:[#allocation16 + $0x8] sm:$0xff] }
  0x7d   : > { %1032 = vmatpush.msrb.mxu2 %v989_v24  ;;  %1012 = vmatpush.msrb.mxu1 %v1005_v29 }
  0x7e   : > { %944 = vmatpush.msrb.mxu0 %v929_v3  ;;  %v1082_v3 = vld [vmem:[#allocation17 + $0x78] sm:$0xff]  ;;  %1102 = vmatpush.msrb.mxu3 %v1101_v2  ;;  %v1197_v2 = vld [vmem:[#allocation19 + $0xd0] sm:$0xff] }
  0x7f   : > { %1033 = vmatpush.msrb.mxu2 %v988_v26  ;;  %1013 = vmatpush.msrb.mxu1 %v1004_v31 }
  0x80   : > { %945 = vmatpush.msrb.mxu0 %v928_v6  ;;  %1103 = vmatpush.msrb.mxu3 %v1100_v4 }
  0x81   : > { %1034 = vmatpush.msrb.mxu2 %v987_v28  ;;  %1014 = vmatpush.msrb.mxu1 %v1003_v34 }
  0x82   : > { %946 = vmatpush.msrb.mxu0 %v927_v9  ;;  %1104 = vmatpush.msrb.mxu3 %v1099_v7  ;;  %v1195_v7 = vld [vmem:[#allocation19 + $0xc0] sm:$0xff] }
  0x83   : > { %1035 = vmatpush.msrb.mxu2 %v986_v30  ;;  %1015 = vmatpush.msrb.mxu1 %v1002_v47  ;;  %v1073_v47 = vld [vmem:[#allocation17 + $0x30] sm:$0xff] }
  0x84   : > { %947 = vmatpush.msrb.mxu0 %v926_v11  ;;  %v1799_v11 = vld [vmem:[%s2629_s6] ss:$0 sm:$0xff]  ;;  %1105 = vmatpush.msrb.mxu3 %v1098_v12 }
  0x85   : > { %1036 = vmatpush.msrb.mxu2 %v985_v32 }
  0x86   : > { %948 = vmatpush.msrb.mxu0 %v925_v13  ;;  %v1079_v13 = vld [vmem:[#allocation17 + $0x60] sm:$0xff] }
  0x88   : > { %949 = vmatpush.msrb.mxu0 %v924_v15 }
  0x8a   : > { %950 = vmatpush.msrb.mxu0 %v923_v18  ;;  %v1097_v18 = vld [vmem:[#allocation17 + $0xd8] sm:$0xff] }
  0x8b   : > { %1106 = vmatpush.msrb.mxu3 %v1097_v18 }
  0x8c   : > { %951 = vmatpush.msrb.mxu0 %v922_v19  ;;  %v1078_v19 = vld [vmem:[#allocation17 + $0x58] sm:$0xff] }
  0x8e   : > { %952 = vmatpush.msrb.mxu0 %v921_v20 }
  0x90   : > { %953 = vmatpush.msrb.mxu0 %v920_v21 }
  0x92   : > { %954 = vmatpush.msrb.mxu0 %v919_v22 }
  0x93   : > { %955 = vmatmul.f32.vlgmr.msrb.gmra.mxu0 %v2466_v16  ;;  %v984_v16 = vld [vmem:[#allocation16 + $0x50] sm:$0xff] }
  0x94   : > { %1037 = vmatpush.msrb.mxu2 %v984_v16  ;;  %1125 = vmatpush.msra.mxu0 %v1082_v3  ;;  %v1077_v16 = vld [vmem:[#allocation17 + $0x50] sm:$0xff] }
  0x96   : > { %1038 = vmatpush.msrb.mxu2 %v983_v50  ;;  %1126 = vmatpush.msra.mxu0 %v1081_v5  ;;  %v1071_v50 = vld [vmem:[#allocation17 + $0x20] sm:$0xff]  ;;  %v1196_v5 = vld [vmem:[#allocation19 + $0xc8] sm:$0xff] }
  0x98   : > { %1039 = vmatpush.msrb.mxu2 %v982_v52  ;;  %1127 = vmatpush.msra.mxu0 %v1080_v8  ;;  %v1070_v52 = vld [vmem:[#allocation17 + $0x18] sm:$0xff] }
  0x9a   : > { %1040 = vmatpush.msrb.mxu2 %v981_v54  ;;  %1128 = vmatpush.msra.mxu0 %v1079_v13  ;;  %v1068_v54 = vld [vmem:[#allocation17 + $0x8] sm:$0xff] }
  0x9b   : > { %958 = vmatmul.f32.gmra.mxu0 %v2470_v17  ;;  %v1001_v17 = vld [vmem:[#allocation16 + $0xc0] sm:$0xff] }
  0x9c   : > { %1016 = vmatpush.msrb.mxu1 %v1001_v17  ;;  %1041 = vmatpush.msrb.mxu2 %v980_v56  ;;  %v1088_v17 = vld [vmem:[#allocation17 + $0x90] sm:$0xff]  ;;  %v1202_v56 = vld [vmem:[#allocation19 + $0xf8] sm:$0xff] }
  0x9d   : > { %1129 = vmatpush.msra.mxu0 %v1078_v19 }
  0x9e   : > { %1017 = vmatpush.msrb.mxu1 %v1000_v48  ;;  %1042 = vmatpush.msrb.mxu2 %v979_v58  ;;  %v1072_v48 = vld [vmem:[#allocation17 + $0x28] sm:$0xff] }
  0x9f   : > { %1130 = vmatpush.msra.mxu0 %v1077_v16  ;;  %v1200_v58 = vld [vmem:[#allocation19 + $0xe8] sm:$0xff]  ;;  %v1175_v16 = vld [vmem:[#allocation19 + $0x38] sm:$0xff] }
  0xa0   : > { %1018 = vmatpush.msrb.mxu1 %v999_v49  ;;  %1043 = vmatpush.msrb.mxu2 %v978_v60  ;;  %v1087_v49 = vld [vmem:[#allocation17 + $0x88] sm:$0xff]  ;;  %v1182_v60 = vld [vmem:[#allocation19 + $0x70] sm:$0xff] }
  0xa2   : > { %1019 = vmatpush.msrb.mxu1 %v998_v51  ;;  %1044 = vmatpush.msrb.mxu2 %v977_v62  ;;  %v1086_v51 = vld [vmem:[#allocation17 + $0x80] sm:$0xff]  ;;  %v1181_v62 = vld [vmem:[#allocation19 + $0x68] sm:$0xff] }
  0xa4   : > { %1020 = vmatpush.msrb.mxu1 %v997_v53  ;;  %1045 = vmatpush.msrb.mxu2 %v976_v63  ;;  %v1069_v53 = vld [vmem:[#allocation17 + $0x10] sm:$0xff]  ;;  %v1198_v63 = vld [vmem:[#allocation19 + $0xd8] sm:$0xff] }
  0xa6   : > { %1021 = vmatpush.msrb.mxu1 %v996_v55  ;;  %1046 = vmatpush.msrb.mxu2 %v975_v0  ;;  %v1067_v55 = vld [vmem:[#allocation17] sm:$0xff] }
  0xa8   : > { %1022 = vmatpush.msrb.mxu1 %v995_v57  ;;  %1047 = vmatpush.msrb.mxu2 %v974_v1  ;;  %v1201_v57 = vld [vmem:[#allocation19 + $0xf0] sm:$0xff] }
  0xa9   : > { %v1800_v1 = vld [vmem:[%s2675_s10] ss:$0 sm:$0xff]  ;;  %s1616_s10 = sshll.u32 %s2678_s7, 4 }
  0xaa   : > { %1023 = vmatpush.msrb.mxu1 %v994_v59  ;;  %v1183_v59 = vld [vmem:[#allocation19 + $0x78] sm:$0xff] }
  0xac   : > { %1024 = vmatpush.msrb.mxu1 %v993_v61  ;;  %v1199_v61 = vld [vmem:[#allocation19 + $0xe0] sm:$0xff] }
  0xae   : > { %1203 = vmatpush.msra.mxu1 %v1202_v56  ;;  %v1294_v56 = vld [vmem:[#allocation20 + $0xf0] sm:$0xff] }
  0xb0   : > { %1204 = vmatpush.msra.mxu1 %v1201_v57  ;;  %v1293_v57 = vld [vmem:[#allocation20 + $0xe8] sm:$0xff] }
  0xb2   : > { %1205 = vmatpush.msra.mxu1 %v1200_v58  ;;  %v1276_v58 = vld [vmem:[#allocation20 + $0x78] sm:$0xff] }
  0xb4   : > { %1206 = vmatpush.msra.mxu1 %v1199_v61  ;;  %v1801_v61 = vld [vmem:[%s2676_s12] ss:$0 sm:$0xff]  ;;  %s2681_s12 = sld [smem:[#allocation43_spill]] }
  0xb6   : > { %1207 = vmatpush.msra.mxu1 %v1198_v63  ;;  %v1274_v63 = vld [vmem:[#allocation20 + $0x68] sm:$0xff] }
  0xb8   : > { %1208 = vmatpush.msra.mxu1 %v1197_v2  ;;  %v1291_v2 = vld [vmem:[#allocation20 + $0xd8] sm:$0xff] }
  0xba   : > { %1209 = vmatpush.msra.mxu1 %v1196_v5  ;;  %v1290_v5 = vld [vmem:[#allocation20 + $0xd0] sm:$0xff]  ;;  %s1417_s23 = scalar_lea.hbm %s2681_s12, %s1616_s10  ;;  %s2095_s21 = scalar_lea.hbm %s2681_s12, 32 }
  0xbc   : > { %1210 = vmatpush.msra.mxu1 %v1195_v7 }
  0xf0   : > { %v789_v35 = vpop.f32.mrf.mxu0 }
  0xf1   : > { %v812_v36 = vpop.f32.mrf.mxu1 }
  0xf2   : > { %v813_v37 = vadd.f32 %v812_v36, %v789_v35  ;;  %v1096_v36 = vld [vmem:[#allocation17 + $0xd0] sm:$0xff] }
  0xf3   : > { %1107 = vmatpush.msrb.mxu3 %v1096_v36  ;;  %v2508_v36 = vld [vmem:[#allocation22 + $0x60] sm:$0xff] }
  0xf4   : > { %v822_v38 = vadd.f32 %v1797_v33, %v813_v37  ;;  %v1095_v37 = vld [vmem:[#allocation17 + $0xc8] sm:$0xff] }
  0xf5   : > { %1108 = vmatpush.msrb.mxu3 %v1095_v37  ;;  %v2511_v37 = vld [vmem:[#allocation22 + $0x58] sm:$0xff] }
  0xf6   : > { %v824_v39 = vmax.f32 %v822_v38, 0.0  ;;  %v1076_v38 = vld [vmem:[#allocation17 + $0x48] sm:$0xff] }
  0xf7   : > { %1131 = vmatpush.msra.mxu0 %v1076_v38  ;;  %v1174_v38 = vld [vmem:[#allocation19 + $0x30] sm:$0xff] }
  0xf8   : > { %826 = vst [vmem:[#allocation3 + $0x8] sm:$0xff] %v824_v39  ;;  %881 = vmatmul.f32.vlgmr.msra.gmra.mxu2 %v824_v39  ;;  %v792_v40 = vpop.f32.mrf.mxu0  ;;  %v1094_v39 = vld [vmem:[#allocation17 + $0xc0] sm:$0xff] }
  0xf9   : > { %v815_v41 = vpop.f32.mrf.mxu1  ;;  %1109 = vmatpush.msrb.mxu3 %v1094_v39  ;;  %1226 = vmatpush.msra.mxu2 %v1183_v59  ;;  %v2514_v39 = vld [vmem:[#allocation22 + $0x50] sm:$0xff] }
  0xfa   : > { %v816_v42 = vadd.f32 %v815_v41, %v792_v40  ;;  %v1075_v40 = vld [vmem:[#allocation17 + $0x40] sm:$0xff]  ;;  %v1093_v41 = vld [vmem:[#allocation17 + $0xb8] sm:$0xff] }
  0xfb   : > { %1132 = vmatpush.msra.mxu0 %v1075_v40  ;;  %1110 = vmatpush.msrb.mxu3 %v1093_v41  ;;  %v1173_v40 = vld [vmem:[#allocation19 + $0x28] sm:$0xff] }
  0xfc   : > { %v823_v43 = vadd.f32 %v1797_v33, %v816_v42  ;;  %v1092_v42 = vld [vmem:[#allocation17 + $0xb0] sm:$0xff]  ;;  %1227 = vmatpush.msra.mxu2 %v1182_v60  ;;  %v2517_v41 = vld [vmem:[#allocation22 + $0x48] sm:$0xff] }
  0xfd   : > { %1111 = vmatpush.msrb.mxu3 %v1092_v42  ;;  %v1172_v42 = vld [vmem:[#allocation19 + $0x20] sm:$0xff]  ;;  %v1275_v60 = vld [vmem:[#allocation20 + $0x70] sm:$0xff] }
  0xfe   : > { %v825_v44 = vmax.f32 %v823_v43, 0.0  ;;  %v1091_v43 = vld [vmem:[#allocation17 + $0xa8] sm:$0xff]  ;;  %1228 = vmatpush.msra.mxu2 %v1181_v62  ;;  %v1292_v62 = vld [vmem:[#allocation20 + $0xe0] sm:$0xff] }
  0xff   : > { %v828_v45 = vld [vmem:[#allocation3 + $0x7] sm:$0xff]  ;;  %1112 = vmatpush.msrb.mxu3 %v1091_v43  ;;  %v2520_v43 = vld [vmem:[#allocation22 + $0x40] sm:$0xff] }
 0x100   : > { %827 = vst [vmem:[#allocation3 + $0x10] sm:$0xff] %v825_v44  ;;  %904 = vmatmul.f32.vlgmr.msra.gmra.mxu3 %v828_v45  ;;  %884 = vmatmul.f32.gmra.mxu2 %v825_v44  ;;  %v1074_v45 = vld [vmem:[#allocation17 + $0x38] sm:$0xff] }
 0x101   : > { %969 = vst [vmem:[#allocation3] sm:$0xff] %v825_v44  ;;  %v1090_v44 = vld [vmem:[#allocation17 + $0xa0] sm:$0xff]  ;;  %1133 = vmatpush.msra.mxu0 %v1074_v45  ;;  %v2523_v45 = vld [vmem:[#allocation22 + $0x38] sm:$0xff] }
 0x102   : > { %1113 = vmatpush.msrb.mxu3 %v1090_v44  ;;  %v1171_v44 = vld [vmem:[#allocation19 + $0x18] sm:$0xff] }
 0x103   : > { %1134 = vmatpush.msra.mxu0 %v1073_v47  ;;  %v2526_v47 = vld [vmem:[#allocation22 + $0x30] sm:$0xff] }
 0x105   : > { %1135 = vmatpush.msra.mxu0 %v1072_v48  ;;  %v2529_v48 = vld [vmem:[#allocation22 + $0x28] sm:$0xff] }
 0x107   : > { %v829_v46 = vld [vmem:[#allocation3 + $0xf] sm:$0xff]  ;;  %1136 = vmatpush.msra.mxu0 %v1071_v50  ;;  %v2532_v50 = vld [vmem:[#allocation22 + $0x20] sm:$0xff] }
 0x108   : > { %907 = vmatmul.f32.gmra.mxu3 %v829_v46  ;;  %v1089_v46 = vld [vmem:[#allocation17 + $0x98] sm:$0xff] }
 0x109   : > { %1114 = vmatpush.msrb.mxu3 %v1089_v46  ;;  %1137 = vmatpush.msra.mxu0 %v1070_v52  ;;  %v1170_v46 = vld [vmem:[#allocation19 + $0x10] sm:$0xff] }
 0x10a   : > { %v2538_v52 = vld [vmem:[#allocation22 + $0x10] sm:$0xff] }
 0x10b   : > { %1115 = vmatpush.msrb.mxu3 %v1088_v17  ;;  %1138 = vmatpush.msra.mxu0 %v1069_v53  ;;  %v1169_v17 = vld [vmem:[#allocation19 + $0x8] sm:$0xff] }
 0x10c   : > { %v2541_v53 = vld [vmem:[#allocation22 + $0x8] sm:$0xff] }
 0x10d   : > { %1116 = vmatpush.msrb.mxu3 %v1087_v49  ;;  %1139 = vmatpush.msra.mxu0 %v1068_v54  ;;  %v1168_v49 = vld [vmem:[#allocation19] sm:$0xff] }
 0x10e   : > { %v2544_v54 = vld [vmem:[#allocation22] sm:$0xff] }
 0x10f   : > { %1117 = vmatpush.msrb.mxu3 %v1086_v51  ;;  %1140 = vmatpush.msra.mxu0 %v1067_v55  ;;  %v2535_v51 = vld [vmem:[#allocation22 + $0x18] sm:$0xff] }
 0x110   : > { %v956_v6 = vpop.f32.mrf.mxu0  ;;  %v1295_v55 = vld [vmem:[#allocation20 + $0xf8] sm:$0xff] }
 0x111   : > { %v957_v21 = vadd.f32 %v1799_v11, %v956_v6  ;;  %1296 = vmatpush.msra.mxu3 %v1295_v55  ;;  %1319 = vmatpush.msrb.mxu0 %v1276_v58 }
 0x113   : > { %1297 = vmatpush.msra.mxu3 %v1294_v56  ;;  %1320 = vmatpush.msrb.mxu0 %v1275_v60  ;;  %v1803_v56 = vld [vmem:[%s2680_s1] ss:$0 sm:$0xff] }
 0x115   : > { %1298 = vmatpush.msra.mxu3 %v1293_v57  ;;  %1321 = vmatpush.msrb.mxu0 %v1274_v63 }
 0x117   : > { %1299 = vmatpush.msra.mxu3 %v1292_v62 }
 0x118   : > { %v959_v24 = vpop.f32.mrf.mxu0 }
 0x119   : > { %v960_v30 = vadd.f32 %v1799_v11, %v959_v24  ;;  %v1188_v24 = vld [vmem:[#allocation19 + $0x88] sm:$0xff]  ;;  %1300 = vmatpush.msra.mxu3 %v1291_v2 }
 0x11b   : > { %1301 = vmatpush.msra.mxu3 %v1290_v5 }
 0x17b   : > { %v882_v9 = vpop.f32.mrf.mxu2 }
 0x183   : > { %v905_v14 = vpop.f32.mrf.mxu3  ;;  %v885_v25 = vpop.f32.mrf.mxu2 }
 0x184   : > { %v906_v15 = vadd.f32 %v905_v14, %v882_v9  ;;  %v1194_v9 = vld [vmem:[#allocation19 + $0xb8] sm:$0xff]  ;;  %v1192_v14 = vld [vmem:[#allocation19 + $0xa8] sm:$0xff] }
 0x185   : > { %1211 = vmatpush.msra.mxu1 %v1194_v9 }
 0x186   : > { %v915_v20 = vadd.f32 %v1798_v10, %v906_v15 }
 0x188   : > { %v917_v22 = vmax.f32 %v915_v20, 0.0 }
 0x18a   : > { %v962_v23 = vadd.f32 %v957_v21, %v917_v22  ;;  %v1191_v21 = vld [vmem:[#allocation19 + $0xa0] sm:$0xff]  ;;  %v1190_v22 = vld [vmem:[#allocation19 + $0x98] sm:$0xff] }
 0x18b   : > { %v908_v26 = vpop.f32.mrf.mxu3 }
 0x18c   : > { %v2487_v27 = vmax.f32 %v962_v23, 0.0  ;;  %v909_v28 = vadd.f32 %v908_v26, %v885_v25  ;;  %v1189_v23 = vld [vmem:[#allocation19 + $0x90] sm:$0xff]  ;;  %v1180_v25 = vld [vmem:[#allocation19 + $0x60] sm:$0xff] }
 0x18d   : > { %1229 = vmatpush.msra.mxu2 %v1180_v25  ;;  %v1187_v26 = vld [vmem:[#allocation19 + $0x80] sm:$0xff] }
 0x18e   : > { %970 = vst [vmem:[#allocation4 + $0x8] sm:$0xff] %v2487_v27  ;;  %v916_v29 = vadd.f32 %v1798_v10, %v909_v28  ;;  %1025 = vmatmul.f32.vlgmr.msrb.gmra.mxu1 %v2487_v27  ;;  %v1193_v10 = vld [vmem:[#allocation19 + $0xb0] sm:$0xff]  ;;  %v1179_v28 = vld [vmem:[#allocation19 + $0x58] sm:$0xff] }
 0x18f   : > { %1212 = vmatpush.msra.mxu1 %v1193_v10  ;;  %1230 = vmatpush.msra.mxu2 %v1179_v28  ;;  %v1288_v10 = vld [vmem:[#allocation20 + $0xc0] sm:$0xff]  ;;  %v1271_v28 = vld [vmem:[#allocation20 + $0x50] sm:$0xff] }
 0x190   : > { %v918_v31 = vmax.f32 %v916_v29, 0.0  ;;  %v2499_v29 = vld [vmem:[#allocation22 + $0x78] sm:$0xff] }
 0x191   : > { %1213 = vmatpush.msra.mxu1 %v1192_v14 }
 0x192   : > { %v963_v32 = vadd.f32 %v960_v30, %v918_v31  ;;  %v1178_v30 = vld [vmem:[#allocation19 + $0x50] sm:$0xff] }
 0x193   : > { %1214 = vmatpush.msra.mxu1 %v1191_v21  ;;  %v2502_v31 = vld [vmem:[#allocation22 + $0x70] sm:$0xff]  ;;  %1231 = vmatpush.msra.mxu2 %v1178_v30  ;;  %v1285_v21 = vld [vmem:[#allocation20 + $0xa8] sm:$0xff] }
 0x194   : > { %v2491_v33 = vmax.f32 %v963_v32, 0.0  ;;  %v1177_v32 = vld [vmem:[#allocation19 + $0x48] sm:$0xff] }
 0x195   : > { %v972_v34 = vld [vmem:[#allocation4 + $0x6] sm:$0xff]  ;;  %1215 = vmatpush.msra.mxu1 %v1190_v22  ;;  %1232 = vmatpush.msra.mxu2 %v1177_v32 }
 0x196   : > { %971 = vst [vmem:[#allocation4 + $0x10] sm:$0xff] %v2491_v33  ;;  %1048 = vmatmul.f32.vlgmr.msrb.gmra.mxu2 %v972_v34  ;;  %1028 = vmatmul.f32.gmra.mxu1 %v2491_v33  ;;  %v2505_v34 = vld [vmem:[#allocation22 + $0x68] sm:$0xff] }
 0x197   : > { %1161 = vst [vmem:[#allocation4] sm:$0xff] %v2491_v33  ;;  %1216 = vmatpush.msra.mxu1 %v1189_v23  ;;  %v1270_v30 = vld [vmem:[#allocation20 + $0x48] sm:$0xff] }
 0x198   : > { %v1281_v32 = vld [vmem:[#allocation20 + $0x88] sm:$0xff] }
 0x199   : > { %1217 = vmatpush.msra.mxu1 %v1188_v24  ;;  %v1283_v24 = vld [vmem:[#allocation20 + $0x98] sm:$0xff] }
 0x19b   : > { %1218 = vmatpush.msra.mxu1 %v1187_v26 }
 0x19d   : > { %v973_v35 = vld [vmem:[#allocation4 + $0xe] sm:$0xff]  ;;  %1370 = vmatpush.msrb.mxu1 %v2499_v29 }
 0x19e   : > { %1051 = vmatmul.f32.gmra.mxu2 %v973_v35  ;;  %v1176_v35 = vld [vmem:[#allocation19 + $0x40] sm:$0xff] }
 0x19f   : > { %1371 = vmatpush.msrb.mxu1 %v2502_v31  ;;  %1233 = vmatpush.msra.mxu2 %v1176_v35  ;;  %v1269_v35 = vld [vmem:[#allocation20 + $0x40] sm:$0xff] }
 0x1a1   : > { %1372 = vmatpush.msrb.mxu1 %v2505_v34  ;;  %1234 = vmatpush.msra.mxu2 %v1175_v16  ;;  %v1280_v16 = vld [vmem:[#allocation20 + $0x80] sm:$0xff] }
 0x1a3   : > { %1373 = vmatpush.msrb.mxu1 %v2508_v36  ;;  %1235 = vmatpush.msra.mxu2 %v1174_v38  ;;  %v1268_v38 = vld [vmem:[#allocation20 + $0x38] sm:$0xff] }
 0x1a5   : > { %1374 = vmatpush.msrb.mxu1 %v2511_v37  ;;  %1236 = vmatpush.msra.mxu2 %v1173_v40  ;;  %v1267_v40 = vld [vmem:[#allocation20 + $0x30] sm:$0xff] }
 0x1a7   : > { %1375 = vmatpush.msrb.mxu1 %v2514_v39  ;;  %1237 = vmatpush.msra.mxu2 %v1172_v42  ;;  %v1266_v42 = vld [vmem:[#allocation20 + $0x28] sm:$0xff] }
 0x1a9   : > { %1376 = vmatpush.msrb.mxu1 %v2517_v41  ;;  %1238 = vmatpush.msra.mxu2 %v1171_v44 }
 0x1ab   : > { %1377 = vmatpush.msrb.mxu1 %v2520_v43  ;;  %1239 = vmatpush.msra.mxu2 %v1170_v46 }
 0x1ad   : > { %1378 = vmatpush.msrb.mxu1 %v2523_v45  ;;  %1240 = vmatpush.msra.mxu2 %v1169_v17 }
 0x1af   : > { %1379 = vmatpush.msrb.mxu1 %v2526_v47  ;;  %1241 = vmatpush.msra.mxu2 %v1168_v49 }
 0x1b1   : > { %1380 = vmatpush.msrb.mxu1 %v2529_v48  ;;  %1617 = vmatpush.msrb.mxu2 %v1276_v58 }
 0x1b3   : > { %1381 = vmatpush.msrb.mxu1 %v2532_v50  ;;  %1618 = vmatpush.msrb.mxu2 %v1275_v60 }
 0x1b5   : > { %1382 = vmatpush.msrb.mxu1 %v2535_v51  ;;  %1619 = vmatpush.msrb.mxu2 %v1274_v63 }
 0x1b7   : > { %1383 = vmatpush.msrb.mxu1 %v2538_v52 }
 0x1b9   : > { %1384 = vmatpush.msrb.mxu1 %v2541_v53 }
 0x1bb   : > { %1385 = vmatpush.msrb.mxu1 %v2544_v54 }
 0x20b   : > { %v1026_v0 = vpop.f32.mrf.mxu1 }
 0x213   : > { %v1029_v11 = vpop.f32.mrf.mxu1 }
 0x219   : > { %v1049_v3 = vpop.f32.mrf.mxu2 }
 0x21a   : > { %v1050_v4 = vadd.f32 %v1049_v3, %v1026_v0  ;;  %v1273_v3 = vld [vmem:[#allocation20 + $0x60] sm:$0xff] }
 0x21b   : > { %1322 = vmatpush.msrb.mxu0 %v1273_v3  ;;  %1620 = vmatpush.msrb.mxu2 %v1273_v3 }
 0x21c   : > { %v1059_v6 = vadd.f32 %v1800_v1, %v1050_v4 }
 0x21e   : > { %v1061_v8 = vmax.f32 %v1059_v6, 0.0  ;;  %v1272_v6 = vld [vmem:[#allocation20 + $0x58] sm:$0xff] }
 0x21f   : > { %1323 = vmatpush.msrb.mxu0 %v1272_v6  ;;  %1621 = vmatpush.msrb.mxu2 %v1272_v6 }
 0x220   : > { %1063 = vst [vmem:[#allocation5 + $0x8] sm:$0xff] %v1061_v8  ;;  %1118 = vmatmul.f32.vlgmr.msrb.gmra.mxu3 %v1061_v8  ;;  %v1289_v8 = vld [vmem:[#allocation20 + $0xc8] sm:$0xff] }
 0x221   : > { %v1052_v12 = vpop.f32.mrf.mxu2  ;;  %1302 = vmatpush.msra.mxu3 %v1289_v8  ;;  %1324 = vmatpush.msrb.mxu0 %v1271_v28 }
 0x222   : > { %v1053_v13 = vadd.f32 %v1052_v12, %v1029_v11  ;;  %1622 = vmatpush.msrb.mxu2 %v1271_v28 }
 0x223   : > { %1303 = vmatpush.msra.mxu3 %v1288_v10  ;;  %1325 = vmatpush.msrb.mxu0 %v1270_v30 }
 0x224   : > { %v1060_v15 = vadd.f32 %v1800_v1, %v1053_v13  ;;  %1623 = vmatpush.msrb.mxu2 %v1270_v30 }
 0x225   : > { %1326 = vmatpush.msrb.mxu0 %v1269_v35 }
 0x226   : > { %v1062_v18 = vmax.f32 %v1060_v15, 0.0  ;;  %v1287_v15 = vld [vmem:[#allocation20 + $0xb8] sm:$0xff]  ;;  %1624 = vmatpush.msrb.mxu2 %v1269_v35 }
 0x227   : > { %v1065_v19 = vld [vmem:[#allocation5 + $0x6] sm:$0xff]  ;;  %1304 = vmatpush.msra.mxu3 %v1287_v15  ;;  %1327 = vmatpush.msrb.mxu0 %v1268_v38 }
 0x228   : > { %1064 = vst [vmem:[#allocation5 + $0x10] sm:$0xff] %v1062_v18  ;;  %1141 = vmatmul.f32.vlgmr.msra.gmra.mxu0 %v1065_v19  ;;  %1121 = vmatmul.f32.gmra.mxu3 %v1062_v18  ;;  %v1286_v19 = vld [vmem:[#allocation20 + $0xb0] sm:$0xff] }
 0x229   : > { %1163 = vst [vmem:[#allocation5] sm:$0xff] %v1062_v18  ;;  %1305 = vmatpush.msra.mxu3 %v1286_v19  ;;  %1625 = vmatpush.msrb.mxu2 %v1268_v38 }
 0x22a   : > { %1328 = vmatpush.msrb.mxu0 %v1267_v40 }
 0x22b   : > { %1306 = vmatpush.msra.mxu3 %v1285_v21  ;;  %1626 = vmatpush.msrb.mxu2 %v1267_v40 }
 0x22c   : > { %1329 = vmatpush.msrb.mxu0 %v1266_v42 }
 0x22d   : > { %1627 = vmatpush.msrb.mxu2 %v1266_v42 }
 0x22f   : > { %v1066_v20 = vld [vmem:[#allocation5 + $0xe] sm:$0xff] }
 0x230   : > { %1144 = vmatmul.f32.gmra.mxu0 %v1066_v20 }
 0x2a3   : > { %v1119_v59 = vpop.f32.mrf.mxu3 }
 0x2a5   : > { %v1142_v0 = vpop.f32.mrf.mxu0 }
 0x2a6   : > { %v1143_v1 = vadd.f32 %v1142_v0, %v1119_v59 }
 0x2a8   : > { %v1152_v4 = vadd.f32 %v1801_v61, %v1143_v1 }
 0x2aa   : > { %v1154_v7 = vmax.f32 %v1152_v4, 0.0 }
 0x2ab   : > { %v1122_v12 = vpop.f32.mrf.mxu3 }
 0x2ac   : > { %v1156_v9 = vadd.f32 %v1154_v7, %v2487_v27  ;;  %v1284_v27 = vld [vmem:[#allocation20 + $0xa0] sm:$0xff] }
 0x2ad   : > { %v1145_v11 = vpop.f32.mrf.mxu0  ;;  %1307 = vmatpush.msra.mxu3 %v1284_v27 }
 0x2ae   : > { %v1158_v13 = vmax.f32 %v1156_v9, 0.0  ;;  %v1146_v14 = vadd.f32 %v1145_v11, %v1122_v12 }
 0x2af   : > { %1308 = vmatpush.msra.mxu3 %v1283_v24 }
 0x2b0   : > { %1164 = vst [vmem:[#allocation6 + $0x8] sm:$0xff] %v1158_v13  ;;  %v1153_v18 = vadd.f32 %v1801_v61, %v1146_v14  ;;  %1219 = vmatmul.f32.vlgmr.msra.gmra.mxu1 %v1158_v13 }
 0x2b2   : > { %v1155_v20 = vmax.f32 %v1153_v18, 0.0 }
 0x2b4   : > { %v1157_v22 = vadd.f32 %v1155_v20, %v2491_v33  ;;  %v1282_v33 = vld [vmem:[#allocation20 + $0x90] sm:$0xff] }
 0x2b5   : > { %1309 = vmatpush.msra.mxu3 %v1282_v33 }
 0x2b6   : > { %v2552_v23 = vmax.f32 %v1157_v22, 0.0 }
 0x2b7   : > { %v1166_v25 = vld [vmem:[#allocation6 + $0x4] sm:$0xff]  ;;  %1310 = vmatpush.msra.mxu3 %v1281_v32 }
 0x2b8   : > { %1165 = vst [vmem:[#allocation6 + $0x10] sm:$0xff] %v2552_v23  ;;  %1242 = vmatmul.f32.vlgmr.msra.gmra.mxu2 %v1166_v25  ;;  %1222 = vmatmul.f32.gmra.mxu1 %v2552_v23 }
 0x2b9   : > { %1398 = vst [vmem:[#allocation6] sm:$0xff] %v2552_v23  ;;  %1311 = vmatpush.msra.mxu3 %v1280_v16 }
 0x2bb   : > { %1633 = vmatpush.msrb.mxu3 %v2499_v29  ;;  %v1265_v29 = vld [vmem:[#allocation20 + $0x20] sm:$0xff] }
 0x2bc   : > { %1330 = vmatpush.msrb.mxu0 %v1265_v29  ;;  %1628 = vmatpush.msrb.mxu2 %v1265_v29 }
 0x2bd   : > { %1634 = vmatpush.msrb.mxu3 %v2502_v31  ;;  %v1264_v31 = vld [vmem:[#allocation20 + $0x18] sm:$0xff] }
 0x2be   : > { %1331 = vmatpush.msrb.mxu0 %v1264_v31  ;;  %1629 = vmatpush.msrb.mxu2 %v1264_v31 }
 0x2bf   : > { %v1167_v26 = vld [vmem:[#allocation6 + $0xc] sm:$0xff]  ;;  %1635 = vmatpush.msrb.mxu3 %v2505_v34  ;;  %v1263_v34 = vld [vmem:[#allocation20 + $0x10] sm:$0xff] }
 0x2c0   : > { %1245 = vmatmul.f32.gmra.mxu2 %v1167_v26  ;;  %1386 = vmatmul.f32.vlgmr.msrb.gmra.mxu1 %v1158_v13 }
 0x2c1   : > { %1636 = vmatpush.msrb.mxu3 %v2508_v36  ;;  %1332 = vmatpush.msrb.mxu0 %v1263_v34  ;;  %v1262_v36 = vld [vmem:[#allocation20 + $0x8] sm:$0xff] }
 0x2c2   : > { %1630 = vmatpush.msrb.mxu2 %v1263_v34 }
 0x2c3   : > { %1637 = vmatpush.msrb.mxu3 %v2511_v37  ;;  %1333 = vmatpush.msrb.mxu0 %v1262_v36  ;;  %v1261_v37 = vld [vmem:[#allocation20] sm:$0xff] }
 0x2c4   : > { %1631 = vmatpush.msrb.mxu2 %v1262_v36 }
 0x2c5   : > { %1638 = vmatpush.msrb.mxu3 %v2514_v39  ;;  %1334 = vmatpush.msrb.mxu0 %v1261_v37 }
 0x2c6   : > { %1632 = vmatpush.msrb.mxu2 %v1261_v37 }
 0x2c7   : > { %1639 = vmatpush.msrb.mxu3 %v2517_v41  ;;  %v1802_v41 = vld [vmem:[%s2677_s19] ss:$0 sm:$0xff]  ;;  %s1420_s19 = sshll.u32 %s1417_s23, 4  ;;  %s1421_s19 = int_to_ptr.hbm [resolvable:$true] %s1420_s19 }
 0x2c8   : > { %s2089_s7 = sshra.s32 %s1421_s19, 4  ;;  %s2090_s7 = int_to_ptr.hbm [resolvable:$true] %s2089_s7 }
 0x2c9   : > { %1640 = vmatpush.msrb.mxu3 %v2520_v43  ;;  %s2091_s9 = scalar_lea.hbm %s2090_s7, 16  ;;  %p2096_p9 = scmp.lt.s32.totalorder %s2090_s7, %s2681_s12 }
 0x2ca   : > { %p2092_p1 = scmp.ne.s32.totalorder %s2090_s7, %s2091_s9  ;;  %p2097_p10 = scmp.lt.s32.totalorder %s2095_s21, %s2091_s9 }
 0x2cb   : > { %1641 = vmatpush.msrb.mxu3 %v2523_v45 }
 0x2cc   : > { %p2093_p3 = pnand %p2092_p1, %p2414_p0  ;;  %p2098_p12 = por %p2097_p10, %p2096_p9 }
 0x2cd   : > { %1642 = vmatpush.msrb.mxu3 %v2526_v47 }
 0x2ce   : > { %p2094_p8 = pneg %p2093_p3 }
 0x2cf   : > { %1643 = vmatpush.msrb.mxu3 %v2529_v48 }
 0x2d0   : > { %p2099_p13 = pnand %p2098_p12, %p2094_p8 }
 0x2d1   : > { %1644 = vmatpush.msrb.mxu3 %v2532_v50 }
 0x2d3   : > { %1645 = vmatpush.msrb.mxu3 %v2535_v51 }
 0x2d5   : > { %1646 = vmatpush.msrb.mxu3 %v2538_v52 }
 0x2d7   : > { %1647 = vmatpush.msrb.mxu3 %v2541_v53 }
 0x2d9   : > { %1648 = vmatpush.msrb.mxu3 %v2544_v54  ;;  %v1804_v54 = vld [vmem:[%s2679_s30] ss:$0 sm:$0xff] }
 0x32d   : > { %v1220_v39 = vpop.f32.mrf.mxu1 }
 0x335   : > { %v1223_v47 = vpop.f32.mrf.mxu1 }
 0x33b   : > { %v1243_v43 = vpop.f32.mrf.mxu2 }
 0x33c   : > { %v1244_v44 = vadd.f32 %v1243_v43, %v1220_v39 }
 0x33d   : > { %v1387_v58 = vpop.f32.mrf.mxu1 }
 0x33e   : > { %v1253_v45 = vadd.f32 %v1802_v41, %v1244_v44  ;;  %v1388_v60 = vadd.f32 %v1803_v56, %v1387_v58 }
 0x340   : > { %v1255_v46 = vmax.f32 %v1253_v45, 0.0 }
 0x342   : > { %1257 = vst [vmem:[#allocation7 + $0x8] sm:$0xff] %v1255_v46  ;;  %1312 = vmatmul.f32.vlgmr.msra.gmra.mxu3 %v1255_v46 }
 0x343   : > { %v1246_v17 = vpop.f32.mrf.mxu2 }
 0x344   : > { %v1247_v48 = vadd.f32 %v1246_v17, %v1223_v47 }
 0x346   : > { %v1254_v49 = vadd.f32 %v1802_v41, %v1247_v48 }
 0x348   : > { %v1256_v50 = vmax.f32 %v1254_v49, 0.0 }
 0x349   : > { %v1259_v51 = vld [vmem:[#allocation7 + $0x4] sm:$0xff] }
 0x34a   : > { %1258 = vst [vmem:[#allocation7 + $0x10] sm:$0xff] %v1256_v50  ;;  %1335 = vmatmul.f32.vlgmr.msrb.gmra.mxu0 %v1259_v51  ;;  %1315 = vmatmul.f32.gmra.mxu3 %v1256_v50 }
 0x34b   : > { %1400 = vst [vmem:[#allocation7] sm:$0xff] %v1256_v50 }
 0x351   : > { %v1260_v52 = vld [vmem:[#allocation7 + $0xc] sm:$0xff] }
 0x352   : > { %1338 = vmatmul.f32.vlgmr.msrb.gmra.mxu2 %v1260_v52  ;;  %1389 = vmatmul.f32.vlgmr.msrb.gmra.mxu3 %v2552_v23 }
 0x3c5   : > { %v1313_v53 = vpop.f32.mrf.mxu3 }
 0x3c7   : > { %v1336_v55 = vpop.f32.mrf.mxu0 }
 0x3c8   : > { %v1337_v57 = vadd.f32 %v1336_v55, %v1313_v53 }
 0x3ca   : > { %v1346_v59 = vadd.f32 %v1804_v54, %v1337_v57 }
 0x3cc   : > { %v1348_v61 = vmax.f32 %v1346_v59, 0.0 }
 0x3cd   : > { %v1316_v62 = vpop.f32.mrf.mxu3 }
 0x3ce   : > { %v1393_v63 = vadd.f32 %v1388_v60, %v1348_v61 }
 0x3d0   : > { %v1395_v0 = vmax.f32 %v1393_v63, 0.0 }
 0x3d2   : > { %1401 = vst [vmem:[%s718_s18] sm:$0xff] %v1395_v0 }
 0x3d5   : > { %v1339_v1 = vpop.f32.mrf.mxu2  ;;  %v1390_v3 = vpop.f32.mrf.mxu3 }
 0x3d6   : > { %v1340_v2 = vadd.f32 %v1339_v1, %v1316_v62  ;;  %v1391_v6 = vadd.f32 %v1803_v56, %v1390_v3 }
 0x3d8   : > { %v1347_v4 = vadd.f32 %v1804_v54, %v1340_v2 }
 0x3da   : > { %v1349_v5 = vmax.f32 %v1347_v4, 0.0 }
 0x3dc   : > { %v1394_v7 = vadd.f32 %v1391_v6, %v1349_v5 }
 0x3de   : > { %v1396_v8 = vmax.f32 %v1394_v7, 0.0 }
 0x3e0   : > { %1402 = vst [vmem:[%s718_s18 + $0x8] sm:$0xff] %v1396_v8 }
 0x3e1   : > { %2102 = shalt.err (!%p2099_p13)
}
 0x3e2   : > { %s2186_s11 = smov 128   ;;  %s2187_s18 = smov 8  }
 0x3e3   : > { %1683 = dma.vmem_to_hbm [thread:$0]  (%p2414_p0), %s1419_s3, 256, %s1421_s19, %s1404_s17, %s2186_s11, %s2186_s11, %s2187_s18  }
 0x3e4 PF: > { %s1435_s10 = sand.u32 1, %s2153_s24   ;;  %p1715_p2 = pnand %p1595_p6, %p2421_p5 }
 0x3e5   : > { %s1436_s5 = scalar_lea.sflag [#allocation10], %s1435_s10 }
 0x3e6   : > { %p1716_p4 = pneg %p1715_p2 }
 0x3e8   : > { %2148 = dma.done.wait (%p1716_p4), %s1436_s5, 256  }
 0x3e9   : > { %2150 = vsyncadd (%p1716_p4), %s1436_s5, 4294967040  ;;  %s37_s29 = sadd.s32 1, %s2173_s29   ;;  %s2682_s24 = smov %s2157_s25 }
 0x3ea   : > { %p34_p7 = scmp.ge.s32.totalorder %s37_s29, 4   ;;  %s2683_s25 = smov %s2161_s26 }
 0x3eb   : > { %s2684_s26 = smov %s2419_s14  ;;  %s2685_s27 = smov %s2169_s28 }
 0x3ec   : > { %s2686_s28 = smov %s2688_s20  ;;  %36 = sbr.rel (!%p34_p7) target bundleno = 24 (0x18), region = 175 }
 0x3f1   :  { %1442 = vsyncpa [#allocation9], 1 }
 0x3f2   :  { %1444 = vsyncpa [#allocation9 + $0x1], 1 }
 0x3f3   :  { %1445 = vsyncpa [#allocation12], 1 }
 0x3f4   :  { %1446 = vsyncpa [#allocation15], 1 }
 0x3f5   :  { %1447 = vsyncpa [#allocation18], 1 }
 0x3f6   :  { %1448 = vsyncpa [#allocation21], 1 }
 0x3f7   :  { %1449 = vsyncpa [#allocation10], 1 }
 0x3f8   :  { %1451 = vsyncpa [#allocation10 + $0x1], 1 }

</bundles_post_ra>
